<compile_context>
chip_gen: v7x
topology: tpu7x:2x2x1
jax: 0.10.0
libtpu: 0.0.40
codegen_flags: <defaults>
</compile_context>

<pallas_src>
import functools

import jax
import jax.numpy as jnp
from jax.experimental import pallas as pl
from jax.experimental.pallas import tpu as pltpu


# --------------------------------------------------------------------------
# Fused kernel: whole WaveNetBlock forward for one batch element.
# --------------------------------------------------------------------------
def _wavenet_block_kernel(x_ref, wf_ref, bf_ref, wd_ref, bd_ref, wp_ref, bp_ref,
                          wl_ref, bl_ref, o_ref, xh_ref,
                          *, stages, pooling_layers, pooling, pool_avg, leaky):
    """x_ref: (1, T0, Cin).  o_ref: (1, T_out, C).  xh_ref: halo scratch."""
    T0, Cin = x_ref.shape[1], x_ref.shape[2]
    C = wf_ref.shape[1]

    def nonlin(v):
        if leaky:
            return jnp.where(v > 0, v, 0.01 * v)          # F.leaky_relu default
        return jnp.maximum(v, 0.0)

    # ---- first 1x1 conv + relu (Cin is tiny -> VPU broadcast-MACs) ----------
    xt = x_ref[0].astype(jnp.float32)                      # (T0, Cin)
    acc = jnp.zeros((T0, C), jnp.float32) + bf_ref[...]    # bias broadcast
    if Cin <= 8:
        for k in range(Cin):
            acc = acc + xt[:, k:k + 1] * wf_ref[k:k + 1, :]
    else:
        acc = acc + jnp.dot(xt, wf_ref[...], preferred_element_type=jnp.float32)
    x = nonlin(acc)                                        # (T0, C) f32

    # ---- dilated stages (static Python loop; activation stays in VMEM) ------
    cur_T = T0
    for i, d in enumerate(stages):
        # Halo scratch layout for this stage:
        #   rows [0, d)              : zeros   (left halo)
        #   rows [d, d+cur_T)        : x
        #   rows [d+cur_T, 2d+cur_T) : zeros   (right halo)
        zrow = jnp.zeros((d, C), jnp.float32)
        xh_ref[pl.ds(0, d), :] = zrow
        xh_ref[pl.ds(d + cur_T, d), :] = zrow
        xh_ref[pl.ds(d, cur_T), :] = x
        x_prev = xh_ref[pl.ds(0, cur_T), :]                # x[t-d] (zero padded)
        x_next = xh_ref[pl.ds(2 * d, cur_T), :]            # x[t+d] (zero padded)

        # K-stacked dilated conv: one (cur_T, 3C) x (3C, C) bf16 MXU matmul.
        xin = jnp.concatenate([x_prev, x, x_next], axis=-1).astype(jnp.bfloat16)
        h = jnp.dot(xin, wd_ref[i], preferred_element_type=jnp.float32) + bd_ref[i]
        h = nonlin(h)

        # 1x1 conv, dropout (identity at inference), residual.
        y = jnp.dot(h.astype(jnp.bfloat16), wp_ref[i],
                    preferred_element_type=jnp.float32) + bp_ref[i]
        x = y + x

        # Fused pooling (kernel=2, stride=2) along time.
        if pooling and (i in pooling_layers):
            To = cur_T // 2
            xr = x[: 2 * To, :].reshape(To, 2, C)
            if pool_avg:
                x = jnp.sum(xr, axis=1)                    # avg_pool1d(k=2) * 2
            else:
                x = jnp.max(xr, axis=1)
            cur_T = To

    # ---- relu + last 1x1 conv ------------------------------------------------
    x = nonlin(x)
    y = jnp.dot(x.astype(jnp.bfloat16), wl_ref[...],
                preferred_element_type=jnp.float32) + bl_ref[...]
    o_ref[0] = y.astype(o_ref.dtype)


# --------------------------------------------------------------------------
# Wrapper: packs weights, builds the single pallas_call (grid over batch).
# Public API keeps the PyTorch NCT layout.
# --------------------------------------------------------------------------
def wavenet_block(x_nct, params, stages, pooling_layers,
                  pooling=True, pooling_type="max", leaky=False):
    """x_nct: [B, in_channels, T] -> [B, out_dims, T_out]."""
    stages = tuple(int(s) for s in stages)
    pooling_layers = tuple(int(i) for i in pooling_layers)
    assert len(stages) >= 1
    B, Cin, T0 = x_nct.shape
    C = params["first_w"].shape[1]
    L = len(stages)
    Dmax = max(stages)

    # ---- host-side weight packing (bf16 for the MXU, f32 biases) ------------
    wf = params["first_w"].astype(jnp.float32)                       # (Cin, C)
    bfb = params["first_b"].astype(jnp.float32)                      # (1, C)
    wd = jnp.stack([jnp.concatenate([p["w0"], p["w1"], p["w2"]], axis=0)
                    for p in params["layers"]]).astype(jnp.bfloat16)  # (L, 3C, C)
    bd = jnp.stack([p["bd"] for p in params["layers"]]).astype(jnp.float32)
    wp = jnp.stack([p["wp"] for p in params["layers"]]).astype(jnp.bfloat16)
    bp = jnp.stack([p["bp"] for p in params["layers"]]).astype(jnp.float32)
    wl = params["last_w"].astype(jnp.bfloat16)
    bl = params["last_b"].astype(jnp.float32)

    # output length after the pooled stages
    T_out = T0
    for i in range(L):
        if pooling and i in pooling_layers:
            T_out //= 2

    # tiny boundary transpose: [B, Cin, T] -> [B, T, Cin]
    x_ntc = jnp.transpose(x_nct, (0, 2, 1)).astype(jnp.float32)

    kern = functools.partial(
        _wavenet_block_kernel, stages=stages, pooling_layers=pooling_layers,
        pooling=pooling, pool_avg=(pooling_type != "max"), leaky=leaky)

    const2 = lambda b: (0, 0)
    const3 = lambda b: (0, 0, 0)
    out = pl.pallas_call(
        kern,
        out_shape=jax.ShapeDtypeStruct((B, T_out, C), jnp.float32),
        grid=(B,),
        in_specs=[
            pl.BlockSpec((1, T0, Cin), lambda b: (b, 0, 0)),   # x
            pl.BlockSpec((Cin, C), const2),                    # first conv W
            pl.BlockSpec((1, C), const2),                      # first conv b
            pl.BlockSpec((L, 3 * C, C), const3),               # stacked dilated W
            pl.BlockSpec((L, 1, C), const3),                   # dilated b
            pl.BlockSpec((L, C, C), const3),                   # 1x1 W
            pl.BlockSpec((L, 1, C), const3),                   # 1x1 b
            pl.BlockSpec((C, C), const2),                      # last conv W
            pl.BlockSpec((1, C), const2),                      # last conv b
        ],
        out_specs=pl.BlockSpec((1, T_out, C), lambda b: (b, 0, 0)),
        scratch_shapes=[pltpu.VMEM((T0 + 2 * Dmax, C), jnp.float32)],
        compiler_params=pltpu.CompilerParams(dimension_semantics=("parallel",)),
    )(x_ntc, wf, bfb, wd, bd, wp, bp, wl, bl)

    return jnp.transpose(out, (0, 2, 1))                          # -> [B, C, T_out]


# --------------------------------------------------------------------------
# Deterministic parameter init (shapes match the PyTorch module)
# --------------------------------------------------------------------------
def init_params(key, in_channels, out_dims, stages):
    n_keys = 4 + 6 * len(stages)
    keys = iter(jax.random.split(key, n_keys))

    def dense(k, cin, cout, extra_fan=1.0):
        return (jax.random.normal(k, (cin, cout), jnp.float32)
                / jnp.sqrt(cin * extra_fan))

    def bias(k, c):
        return jax.random.normal(k, (1, c), jnp.float32) * 0.01

    params = {
        "first_w": dense(next(keys), in_channels, out_dims),
        "first_b": bias(next(keys), out_dims),
        "last_w": dense(next(keys), out_dims, out_dims),
        "last_b": bias(next(keys), out_dims),
        "layers": [],
    }
    for _ in stages:
        params["layers"].append({
            # dilated conv taps (kernel_size=3): W[:, :, k].T in [Cin, Cout]
            "w0": dense(next(keys), out_dims, out_dims, 3.0),   # x[t-d]
            "w1": dense(next(keys), out_dims, out_dims, 3.0),   # x[t]
            "w2": dense(next(keys), out_dims, out_dims, 3.0),   # x[t+d]
            "bd": bias(next(keys), out_dims),
            "wp": dense(next(keys), out_dims, out_dims),
            "bp": bias(next(keys), out_dims),
        })
    return params


# --------------------------------------------------------------------------
# Pure-JAX reference (same math, same bf16-MXU / f32-accumulate precision)
# --------------------------------------------------------------------------
def _ref_block(x_nct, params, stages, pooling_layers,
               pooling=True, pooling_type="max", leaky=False):
    def mm(a, w):   # mirrors the kernel: bf16 operands, f32 accumulation
        return jnp.einsum("btc,cd->btd", a.astype(jnp.bfloat16),
                          w.astype(jnp.bfloat16),
                          preferred_element_type=jnp.float32)

    nonlin = (lambda v: jnp.where(v > 0, v, 0.01 * v)) if leaky else jax.nn.relu

    x = jnp.transpose(x_nct, (0, 2, 1))
    x = nonlin(jnp.einsum("btc,cd->btd", x, params["first_w"])
               + params["first_b"][None])
    for i, d in enumerate(stages):
        p = params["layers"][i]
        T = x.shape[1]
        xp = jnp.pad(x, ((0, 0), (d, 0), (0, 0)))[:, :T]
        xn = jnp.pad(x, ((0, 0), (0, d), (0, 0)))[:, d:]
        h = mm(xp, p["w0"]) + mm(x, p["w1"]) + mm(xn, p["w2"]) + p["bd"][None]
        h = nonlin(h)
        y = mm(h, p["wp"]) + p["bp"][None]
        x = y + x
        if pooling and (i in pooling_layers):
            B, T, C = x.shape
            To = T // 2
            xr = x[:, :2 * To].reshape(B, To, 2, C)
            if pooling_type != "max":
                x = xr[:, :, 0] + xr[:, :, 1]               # avg_pool1d(k=2) * 2
            else:
                x = jnp.max(xr, axis=2)
    x = nonlin(x)
    x = mm(x, params["last_w"]) + params["last_b"][None]
    return jnp.transpose(x, (0, 2, 1))


# --------------------------------------------------------------------------
if __name__ == "__main__":
    # Small but representative configuration.
    B, in_channels, T = 2, 4, 64
    out_dims = 64
    stages = (1, 2, 4, 8)          # dilations
    pooling_layers = (1, 2)        # pool (k=2) after layers 1 and 2 -> T/4

    key = jax.random.PRNGKey(0)
    kx, kp = jax.random.split(key)
    x = jax.random.normal(kx, (B, in_channels, T), jnp.float32)
    params = init_params(kp, in_channels, out_dims, stages)

    out = wavenet_block(x, params, stages, pooling_layers)
    out = jax.block_until_ready(out)

    assert out.shape == (B, out_dims, T // 4), out.shape

    ref = _ref_block(x, params, stages, pooling_layers)
    max_err = float(jnp.max(jnp.abs(out - ref)))
    assert jnp.allclose(out, ref, atol=2e-2, rtol=2e-2), max_err

    print("KERNEL_OK")
</pallas_src>

<mosaic_0001>
module attributes {stable_mosaic.version = 11 : i64} {
  func.func @_wavenet_block_kernel(%arg0: i32, %arg1: memref<1x64x4xf32, #tpu.memory_space<vmem>>, %arg2: memref<4x64xf32, #tpu.memory_space<vmem>>, %arg3: memref<1x64xf32, #tpu.memory_space<vmem>>, %arg4: memref<4x192x64xbf16, #tpu.memory_space<vmem>>, %arg5: memref<4x1x64xf32, #tpu.memory_space<vmem>>, %arg6: memref<4x64x64xbf16, #tpu.memory_space<vmem>>, %arg7: memref<4x1x64xf32, #tpu.memory_space<vmem>>, %arg8: memref<64x64xbf16, #tpu.memory_space<vmem>>, %arg9: memref<1x64xf32, #tpu.memory_space<vmem>>, %arg10: memref<1x16x64xf32, #tpu.memory_space<vmem>>, %arg11: memref<80x64xf32, #tpu.memory_space<vmem>>) attributes {dimension_semantics = [#tpu.dimension_semantics<parallel>], iteration_bounds = array<i64: 2>, scalar_prefetch = 0 : i64, scratch_operands = 1 : i64, tpu.core_type = #tpu.core_type<tc>, window_params = [{transform_indices = @transform_0, window_bounds = array<i64: 1, 64, 4>}, {pipeline_mode = #tpu.pipeline_mode<synchronous>, transform_indices = @transform_1, window_bounds = array<i64: 4, 64>}, {pipeline_mode = #tpu.pipeline_mode<synchronous>, transform_indices = @transform_2, window_bounds = array<i64: 1, 64>}, {pipeline_mode = #tpu.pipeline_mode<synchronous>, transform_indices = @transform_3, window_bounds = array<i64: 4, 192, 64>}, {pipeline_mode = #tpu.pipeline_mode<synchronous>, transform_indices = @transform_4, window_bounds = array<i64: 4, 1, 64>}, {pipeline_mode = #tpu.pipeline_mode<synchronous>, transform_indices = @transform_5, window_bounds = array<i64: 4, 64, 64>}, {pipeline_mode = #tpu.pipeline_mode<synchronous>, transform_indices = @transform_6, window_bounds = array<i64: 4, 1, 64>}, {pipeline_mode = #tpu.pipeline_mode<synchronous>, transform_indices = @transform_7, window_bounds = array<i64: 64, 64>}, {pipeline_mode = #tpu.pipeline_mode<synchronous>, transform_indices = @transform_8, window_bounds = array<i64: 1, 64>}, {transform_indices = @transform_9, window_bounds = array<i64: 1, 16, 64>}]} {
    %c0 = arith.constant 0 : index
    %c0_0 = arith.constant 0 : index
    %c0_1 = arith.constant 0 : index
    %0 = vector.load %arg1[%c0, %c0_0, %c0_1] : memref<1x64x4xf32, #tpu.memory_space<vmem>>, vector<1x64x4xf32>
    %1 = vector.shape_cast %0 : vector<1x64x4xf32> to vector<64x4xf32>
    %cst = arith.constant 0.000000e+00 : f32
    %2 = vector.broadcast %cst : f32 to vector<64x64xf32>
    %c0_2 = arith.constant 0 : index
    %c0_3 = arith.constant 0 : index
    %3 = vector.load %arg3[%c0_2, %c0_3] : memref<1x64xf32, #tpu.memory_space<vmem>>, vector<1x64xf32>
    %4 = vector.broadcast %3 : vector<1x64xf32> to vector<64x64xf32>
    %5 = arith.addf %2, %4 : vector<64x64xf32>
    %6 = vector.extract_strided_slice %1 {offsets = [0, 0], sizes = [64, 1], strides = [1, 1]} : vector<64x4xf32> to vector<64x1xf32>
    %c0_4 = arith.constant 0 : index
    %c0_5 = arith.constant 0 : index
    %7 = vector.load %arg2[%c0_4, %c0_5] : memref<4x64xf32, #tpu.memory_space<vmem>>, vector<1x64xf32>
    %8 = vector.broadcast %6 : vector<64x1xf32> to vector<64x64xf32>
    %9 = vector.broadcast %7 : vector<1x64xf32> to vector<64x64xf32>
    %10 = arith.mulf %8, %9 : vector<64x64xf32>
    %11 = arith.addf %5, %10 : vector<64x64xf32>
    %12 = vector.extract_strided_slice %1 {offsets = [0, 1], sizes = [64, 1], strides = [1, 1]} : vector<64x4xf32> to vector<64x1xf32>
    %c1 = arith.constant 1 : index
    %c0_6 = arith.constant 0 : index
    %13 = vector.load %arg2[%c1, %c0_6] : memref<4x64xf32, #tpu.memory_space<vmem>>, vector<1x64xf32>
    %14 = vector.broadcast %12 : vector<64x1xf32> to vector<64x64xf32>
    %15 = vector.broadcast %13 : vector<1x64xf32> to vector<64x64xf32>
    %16 = arith.mulf %14, %15 : vector<64x64xf32>
    %17 = arith.addf %11, %16 : vector<64x64xf32>
    %18 = vector.extract_strided_slice %1 {offsets = [0, 2], sizes = [64, 1], strides = [1, 1]} : vector<64x4xf32> to vector<64x1xf32>
    %c2 = arith.constant 2 : index
    %c0_7 = arith.constant 0 : index
    %19 = vector.load %arg2[%c2, %c0_7] : memref<4x64xf32, #tpu.memory_space<vmem>>, vector<1x64xf32>
    %20 = vector.broadcast %18 : vector<64x1xf32> to vector<64x64xf32>
    %21 = vector.broadcast %19 : vector<1x64xf32> to vector<64x64xf32>
    %22 = arith.mulf %20, %21 : vector<64x64xf32>
    %23 = arith.addf %17, %22 : vector<64x64xf32>
    %24 = vector.extract_strided_slice %1 {offsets = [0, 3], sizes = [64, 1], strides = [1, 1]} : vector<64x4xf32> to vector<64x1xf32>
    %c3 = arith.constant 3 : index
    %c0_8 = arith.constant 0 : index
    %25 = vector.load %arg2[%c3, %c0_8] : memref<4x64xf32, #tpu.memory_space<vmem>>, vector<1x64xf32>
    %26 = vector.broadcast %24 : vector<64x1xf32> to vector<64x64xf32>
    %27 = vector.broadcast %25 : vector<1x64xf32> to vector<64x64xf32>
    %28 = arith.mulf %26, %27 : vector<64x64xf32>
    %29 = arith.addf %23, %28 : vector<64x64xf32>
    %cst_9 = arith.constant 0.000000e+00 : f32
    %30 = vector.broadcast %cst_9 : f32 to vector<64x64xf32>
    %31 = arith.maximumf %29, %30 : vector<64x64xf32>
    %cst_10 = arith.constant 0.000000e+00 : f32
    %32 = vector.broadcast %cst_10 : f32 to vector<1x64xf32>
    %c0_11 = arith.constant 0 : index
    %c0_12 = arith.constant 0 : index
    %33 = vector.load %arg11[%c0_11, %c0_12] : memref<80x64xf32, #tpu.memory_space<vmem>>, vector<1x64xf32>
    tpu.vector_store %arg11[%c0_11, %c0_12], %32 {strides = array<i32>} : memref<80x64xf32, #tpu.memory_space<vmem>>, vector<1x64xf32>,
    %c65 = arith.constant 65 : index
    %c0_13 = arith.constant 0 : index
    %34 = vector.load %arg11[%c65, %c0_13] : memref<80x64xf32, #tpu.memory_space<vmem>>, vector<1x64xf32>
    tpu.vector_store %arg11[%c65, %c0_13], %32 {strides = array<i32>} : memref<80x64xf32, #tpu.memory_space<vmem>>, vector<1x64xf32>,
    %c1_14 = arith.constant 1 : index
    %c0_15 = arith.constant 0 : index
    %35 = vector.load %arg11[%c1_14, %c0_15] : memref<80x64xf32, #tpu.memory_space<vmem>>, vector<64x64xf32>
    tpu.vector_store %arg11[%c1_14, %c0_15], %31 {strides = array<i32>} : memref<80x64xf32, #tpu.memory_space<vmem>>, vector<64x64xf32>,
    %c0_16 = arith.constant 0 : index
    %c0_17 = arith.constant 0 : index
    %36 = vector.load %arg11[%c0_16, %c0_17] : memref<80x64xf32, #tpu.memory_space<vmem>>, vector<64x64xf32>
    %c2_18 = arith.constant 2 : index
    %c0_19 = arith.constant 0 : index
    %37 = vector.load %arg11[%c2_18, %c0_19] : memref<80x64xf32, #tpu.memory_space<vmem>>, vector<64x64xf32>
    %38 = tpu.concatenate %36, %31, %37 in 1 : vector<64x64xf32>, vector<64x64xf32>, vector<64x64xf32> -> vector<64x192xf32>
    %39 = arith.truncf %38 : vector<64x192xf32> to vector<64x192xbf16>
    %c0_20 = arith.constant 0 : index
    %c0_21 = arith.constant 0 : index
    %c0_22 = arith.constant 0 : index
    %40 = vector.load %arg4[%c0_20, %c0_21, %c0_22] : memref<4x192x64xbf16, #tpu.memory_space<vmem>>, vector<1x192x64xbf16>
    %41 = vector.shape_cast %40 : vector<1x192x64xbf16> to vector<192x64xbf16>
    %cst_23 = arith.constant dense<0.000000e+00> : vector<64x64xf32>
    %42 = tpu.matmul %39, %41, %cst_23 {dimension_numbers = #tpu.dot_dimension_numbers<[1], [0], [0], [1], [0, 0, 1, 1], [], []>} : vector<64x192xbf16>, vector<192x64xbf16>, vector<64x64xf32> -> vector<64x64xf32>
    %c0_24 = arith.constant 0 : index
    %c0_25 = arith.constant 0 : index
    %c0_26 = arith.constant 0 : index
    %43 = vector.load %arg5[%c0_24, %c0_25, %c0_26] : memref<4x1x64xf32, #tpu.memory_space<vmem>>, vector<1x1x64xf32>
    %44 = vector.shape_cast %43 : vector<1x1x64xf32> to vector<1x64xf32>
    %45 = vector.broadcast %44 : vector<1x64xf32> to vector<64x64xf32>
    %46 = arith.addf %42, %45 : vector<64x64xf32>
    %cst_27 = arith.constant 0.000000e+00 : f32
    %47 = vector.broadcast %cst_27 : f32 to vector<64x64xf32>
    %48 = arith.maximumf %46, %47 : vector<64x64xf32>
    %49 = arith.truncf %48 : vector<64x64xf32> to vector<64x64xbf16>
    %c0_28 = arith.constant 0 : index
    %c0_29 = arith.constant 0 : index
    %c0_30 = arith.constant 0 : index
    %50 = vector.load %arg6[%c0_28, %c0_29, %c0_30] : memref<4x64x64xbf16, #tpu.memory_space<vmem>>, vector<1x64x64xbf16>
    %51 = vector.shape_cast %50 : vector<1x64x64xbf16> to vector<64x64xbf16>
    %cst_31 = arith.constant dense<0.000000e+00> : vector<64x64xf32>
    %52 = tpu.matmul %49, %51, %cst_31 {dimension_numbers = #tpu.dot_dimension_numbers<[1], [0], [0], [1], [0, 0, 1, 1], [], []>} : vector<64x64xbf16>, vector<64x64xbf16>, vector<64x64xf32> -> vector<64x64xf32>
    %c0_32 = arith.constant 0 : index
    %c0_33 = arith.constant 0 : index
    %c0_34 = arith.constant 0 : index
    %53 = vector.load %arg7[%c0_32, %c0_33, %c0_34] : memref<4x1x64xf32, #tpu.memory_space<vmem>>, vector<1x1x64xf32>
    %54 = vector.shape_cast %53 : vector<1x1x64xf32> to vector<1x64xf32>
    %55 = vector.broadcast %54 : vector<1x64xf32> to vector<64x64xf32>
    %56 = arith.addf %52, %55 : vector<64x64xf32>
    %57 = arith.addf %56, %31 : vector<64x64xf32>
    %cst_35 = arith.constant 0.000000e+00 : f32
    %58 = vector.broadcast %cst_35 : f32 to vector<2x64xf32>
    %c0_36 = arith.constant 0 : index
    %c0_37 = arith.constant 0 : index
    %59 = vector.load %arg11[%c0_36, %c0_37] : memref<80x64xf32, #tpu.memory_space<vmem>>, vector<2x64xf32>
    tpu.vector_store %arg11[%c0_36, %c0_37], %58 {strides = array<i32>} : memref<80x64xf32, #tpu.memory_space<vmem>>, vector<2x64xf32>,
    %c66 = arith.constant 66 : index
    %c0_38 = arith.constant 0 : index
    %60 = vector.load %arg11[%c66, %c0_38] : memref<80x64xf32, #tpu.memory_space<vmem>>, vector<2x64xf32>
    tpu.vector_store %arg11[%c66, %c0_38], %58 {strides = array<i32>} : memref<80x64xf32, #tpu.memory_space<vmem>>, vector<2x64xf32>,
    %c2_39 = arith.constant 2 : index
    %c0_40 = arith.constant 0 : index
    %61 = vector.load %arg11[%c2_39, %c0_40] : memref<80x64xf32, #tpu.memory_space<vmem>>, vector<64x64xf32>
    tpu.vector_store %arg11[%c2_39, %c0_40], %57 {strides = array<i32>} : memref<80x64xf32, #tpu.memory_space<vmem>>, vector<64x64xf32>,
    %c0_41 = arith.constant 0 : index
    %c0_42 = arith.constant 0 : index
    %62 = vector.load %arg11[%c0_41, %c0_42] : memref<80x64xf32, #tpu.memory_space<vmem>>, vector<64x64xf32>
    %c4 = arith.constant 4 : index
    %c0_43 = arith.constant 0 : index
    %63 = vector.load %arg11[%c4, %c0_43] : memref<80x64xf32, #tpu.memory_space<vmem>>, vector<64x64xf32>
    %64 = tpu.concatenate %62, %57, %63 in 1 : vector<64x64xf32>, vector<64x64xf32>, vector<64x64xf32> -> vector<64x192xf32>
    %65 = arith.truncf %64 : vector<64x192xf32> to vector<64x192xbf16>
    %c1_44 = arith.constant 1 : index
    %c0_45 = arith.constant 0 : index
    %c0_46 = arith.constant 0 : index
    %66 = vector.load %arg4[%c1_44, %c0_45, %c0_46] : memref<4x192x64xbf16, #tpu.memory_space<vmem>>, vector<1x192x64xbf16>
    %67 = vector.shape_cast %66 : vector<1x192x64xbf16> to vector<192x64xbf16>
    %cst_47 = arith.constant dense<0.000000e+00> : vector<64x64xf32>
    %68 = tpu.matmul %65, %67, %cst_47 {dimension_numbers = #tpu.dot_dimension_numbers<[1], [0], [0], [1], [0, 0, 1, 1], [], []>} : vector<64x192xbf16>, vector<192x64xbf16>, vector<64x64xf32> -> vector<64x64xf32>
    %c1_48 = arith.constant 1 : index
    %c0_49 = arith.constant 0 : index
    %c0_50 = arith.constant 0 : index
    %69 = vector.load %arg5[%c1_48, %c0_49, %c0_50] : memref<4x1x64xf32, #tpu.memory_space<vmem>>, vector<1x1x64xf32>
    %70 = vector.shape_cast %69 : vector<1x1x64xf32> to vector<1x64xf32>
    %71 = vector.broadcast %70 : vector<1x64xf32> to vector<64x64xf32>
    %72 = arith.addf %68, %71 : vector<64x64xf32>
    %cst_51 = arith.constant 0.000000e+00 : f32
    %73 = vector.broadcast %cst_51 : f32 to vector<64x64xf32>
    %74 = arith.maximumf %72, %73 : vector<64x64xf32>
    %75 = arith.truncf %74 : vector<64x64xf32> to vector<64x64xbf16>
    %c1_52 = arith.constant 1 : index
    %c0_53 = arith.constant 0 : index
    %c0_54 = arith.constant 0 : index
    %76 = vector.load %arg6[%c1_52, %c0_53, %c0_54] : memref<4x64x64xbf16, #tpu.memory_space<vmem>>, vector<1x64x64xbf16>
    %77 = vector.shape_cast %76 : vector<1x64x64xbf16> to vector<64x64xbf16>
    %cst_55 = arith.constant dense<0.000000e+00> : vector<64x64xf32>
    %78 = tpu.matmul %75, %77, %cst_55 {dimension_numbers = #tpu.dot_dimension_numbers<[1], [0], [0], [1], [0, 0, 1, 1], [], []>} : vector<64x64xbf16>, vector<64x64xbf16>, vector<64x64xf32> -> vector<64x64xf32>
    %c1_56 = arith.constant 1 : index
    %c0_57 = arith.constant 0 : index
    %c0_58 = arith.constant 0 : index
    %79 = vector.load %arg7[%c1_56, %c0_57, %c0_58] : memref<4x1x64xf32, #tpu.memory_space<vmem>>, vector<1x1x64xf32>
    %80 = vector.shape_cast %79 : vector<1x1x64xf32> to vector<1x64xf32>
    %81 = vector.broadcast %80 : vector<1x64xf32> to vector<64x64xf32>
    %82 = arith.addf %78, %81 : vector<64x64xf32>
    %83 = arith.addf %82, %57 : vector<64x64xf32>
    %84 = vector.shape_cast %83 : vector<64x64xf32> to vector<32x2x64xf32>
    %cst_59 = arith.constant dense<0xFF800000> : vector<32x64xf32>
    %85 = vector.multi_reduction <maximumf>, %84, %cst_59 [1] : vector<32x2x64xf32> to vector<32x64xf32>
    %cst_60 = arith.constant 0.000000e+00 : f32
    %86 = vector.broadcast %cst_60 : f32 to vector<4x64xf32>
    %c0_61 = arith.constant 0 : index
    %c0_62 = arith.constant 0 : index
    %87 = vector.load %arg11[%c0_61, %c0_62] : memref<80x64xf32, #tpu.memory_space<vmem>>, vector<4x64xf32>
    tpu.vector_store %arg11[%c0_61, %c0_62], %86 {strides = array<i32>} : memref<80x64xf32, #tpu.memory_space<vmem>>, vector<4x64xf32>,
    %c36 = arith.constant 36 : index
    %c0_63 = arith.constant 0 : index
    %88 = vector.load %arg11[%c36, %c0_63] : memref<80x64xf32, #tpu.memory_space<vmem>>, vector<4x64xf32>
    tpu.vector_store %arg11[%c36, %c0_63], %86 {strides = array<i32>} : memref<80x64xf32, #tpu.memory_space<vmem>>, vector<4x64xf32>,
    %c4_64 = arith.constant 4 : index
    %c0_65 = arith.constant 0 : index
    %89 = vector.load %arg11[%c4_64, %c0_65] : memref<80x64xf32, #tpu.memory_space<vmem>>, vector<32x64xf32>
    tpu.vector_store %arg11[%c4_64, %c0_65], %85 {strides = array<i32>} : memref<80x64xf32, #tpu.memory_space<vmem>>, vector<32x64xf32>,
    %c0_66 = arith.constant 0 : index
    %c0_67 = arith.constant 0 : index
    %90 = vector.load %arg11[%c0_66, %c0_67] : memref<80x64xf32, #tpu.memory_space<vmem>>, vector<32x64xf32>
    %c8 = arith.constant 8 : index
    %c0_68 = arith.constant 0 : index
    %91 = vector.load %arg11[%c8, %c0_68] : memref<80x64xf32, #tpu.memory_space<vmem>>, vector<32x64xf32>
    %92 = tpu.concatenate %90, %85, %91 in 1 : vector<32x64xf32>, vector<32x64xf32>, vector<32x64xf32> -> vector<32x192xf32>
    %93 = arith.truncf %92 : vector<32x192xf32> to vector<32x192xbf16>
    %c2_69 = arith.constant 2 : index
    %c0_70 = arith.constant 0 : index
    %c0_71 = arith.constant 0 : index
    %94 = vector.load %arg4[%c2_69, %c0_70, %c0_71] : memref<4x192x64xbf16, #tpu.memory_space<vmem>>, vector<1x192x64xbf16>
    %95 = vector.shape_cast %94 : vector<1x192x64xbf16> to vector<192x64xbf16>
    %cst_72 = arith.constant dense<0.000000e+00> : vector<32x64xf32>
    %96 = tpu.matmul %93, %95, %cst_72 {dimension_numbers = #tpu.dot_dimension_numbers<[1], [0], [0], [1], [0, 0, 1, 1], [], []>} : vector<32x192xbf16>, vector<192x64xbf16>, vector<32x64xf32> -> vector<32x64xf32>
    %c2_73 = arith.constant 2 : index
    %c0_74 = arith.constant 0 : index
    %c0_75 = arith.constant 0 : index
    %97 = vector.load %arg5[%c2_73, %c0_74, %c0_75] : memref<4x1x64xf32, #tpu.memory_space<vmem>>, vector<1x1x64xf32>
    %98 = vector.shape_cast %97 : vector<1x1x64xf32> to vector<1x64xf32>
    %99 = vector.broadcast %98 : vector<1x64xf32> to vector<32x64xf32>
    %100 = arith.addf %96, %99 : vector<32x64xf32>
    %cst_76 = arith.constant 0.000000e+00 : f32
    %101 = vector.broadcast %cst_76 : f32 to vector<32x64xf32>
    %102 = arith.maximumf %100, %101 : vector<32x64xf32>
    %103 = arith.truncf %102 : vector<32x64xf32> to vector<32x64xbf16>
    %c2_77 = arith.constant 2 : index
    %c0_78 = arith.constant 0 : index
    %c0_79 = arith.constant 0 : index
    %104 = vector.load %arg6[%c2_77, %c0_78, %c0_79] : memref<4x64x64xbf16, #tpu.memory_space<vmem>>, vector<1x64x64xbf16>
    %105 = vector.shape_cast %104 : vector<1x64x64xbf16> to vector<64x64xbf16>
    %cst_80 = arith.constant dense<0.000000e+00> : vector<32x64xf32>
    %106 = tpu.matmul %103, %105, %cst_80 {dimension_numbers = #tpu.dot_dimension_numbers<[1], [0], [0], [1], [0, 0, 1, 1], [], []>} : vector<32x64xbf16>, vector<64x64xbf16>, vector<32x64xf32> -> vector<32x64xf32>
    %c2_81 = arith.constant 2 : index
    %c0_82 = arith.constant 0 : index
    %c0_83 = arith.constant 0 : index
    %107 = vector.load %arg7[%c2_81, %c0_82, %c0_83] : memref<4x1x64xf32, #tpu.memory_space<vmem>>, vector<1x1x64xf32>
    %108 = vector.shape_cast %107 : vector<1x1x64xf32> to vector<1x64xf32>
    %109 = vector.broadcast %108 : vector<1x64xf32> to vector<32x64xf32>
    %110 = arith.addf %106, %109 : vector<32x64xf32>
    %111 = arith.addf %110, %85 : vector<32x64xf32>
    %112 = vector.shape_cast %111 : vector<32x64xf32> to vector<16x2x64xf32>
    %cst_84 = arith.constant dense<0xFF800000> : vector<16x64xf32>
    %113 = vector.multi_reduction <maximumf>, %112, %cst_84 [1] : vector<16x2x64xf32> to vector<16x64xf32>
    %cst_85 = arith.constant 0.000000e+00 : f32
    %114 = vector.broadcast %cst_85 : f32 to vector<8x64xf32>
    %c0_86 = arith.constant 0 : index
    %c0_87 = arith.constant 0 : index
    %115 = vector.load %arg11[%c0_86, %c0_87] : memref<80x64xf32, #tpu.memory_space<vmem>>, vector<8x64xf32>
    tpu.vector_store %arg11[%c0_86, %c0_87], %114 {strides = array<i32>} : memref<80x64xf32, #tpu.memory_space<vmem>>, vector<8x64xf32>,
    %c24 = arith.constant 24 : index
    %c0_88 = arith.constant 0 : index
    %116 = vector.load %arg11[%c24, %c0_88] : memref<80x64xf32, #tpu.memory_space<vmem>>, vector<8x64xf32>
    tpu.vector_store %arg11[%c24, %c0_88], %114 {strides = array<i32>} : memref<80x64xf32, #tpu.memory_space<vmem>>, vector<8x64xf32>,
    %c8_89 = arith.constant 8 : index
    %c0_90 = arith.constant 0 : index
    %117 = vector.load %arg11[%c8_89, %c0_90] : memref<80x64xf32, #tpu.memory_space<vmem>>, vector<16x64xf32>
    tpu.vector_store %arg11[%c8_89, %c0_90], %113 {strides = array<i32>} : memref<80x64xf32, #tpu.memory_space<vmem>>, vector<16x64xf32>,
    %c0_91 = arith.constant 0 : index
    %c0_92 = arith.constant 0 : index
    %118 = vector.load %arg11[%c0_91, %c0_92] : memref<80x64xf32, #tpu.memory_space<vmem>>, vector<16x64xf32>
    %c16 = arith.constant 16 : index
    %c0_93 = arith.constant 0 : index
    %119 = vector.load %arg11[%c16, %c0_93] : memref<80x64xf32, #tpu.memory_space<vmem>>, vector<16x64xf32>
    %120 = tpu.concatenate %118, %113, %119 in 1 : vector<16x64xf32>, vector<16x64xf32>, vector<16x64xf32> -> vector<16x192xf32>
    %121 = arith.truncf %120 : vector<16x192xf32> to vector<16x192xbf16>
    %c3_94 = arith.constant 3 : index
    %c0_95 = arith.constant 0 : index
    %c0_96 = arith.constant 0 : index
    %122 = vector.load %arg4[%c3_94, %c0_95, %c0_96] : memref<4x192x64xbf16, #tpu.memory_space<vmem>>, vector<1x192x64xbf16>
    %123 = vector.shape_cast %122 : vector<1x192x64xbf16> to vector<192x64xbf16>
    %cst_97 = arith.constant dense<0.000000e+00> : vector<16x64xf32>
    %124 = tpu.matmul %121, %123, %cst_97 {dimension_numbers = #tpu.dot_dimension_numbers<[1], [0], [0], [1], [0, 0, 1, 1], [], []>} : vector<16x192xbf16>, vector<192x64xbf16>, vector<16x64xf32> -> vector<16x64xf32>
    %c3_98 = arith.constant 3 : index
    %c0_99 = arith.constant 0 : index
    %c0_100 = arith.constant 0 : index
    %125 = vector.load %arg5[%c3_98, %c0_99, %c0_100] : memref<4x1x64xf32, #tpu.memory_space<vmem>>, vector<1x1x64xf32>
    %126 = vector.shape_cast %125 : vector<1x1x64xf32> to vector<1x64xf32>
    %127 = vector.broadcast %126 : vector<1x64xf32> to vector<16x64xf32>
    %128 = arith.addf %124, %127 : vector<16x64xf32>
    %cst_101 = arith.constant 0.000000e+00 : f32
    %129 = vector.broadcast %cst_101 : f32 to vector<16x64xf32>
    %130 = arith.maximumf %128, %129 : vector<16x64xf32>
    %131 = arith.truncf %130 : vector<16x64xf32> to vector<16x64xbf16>
    %c3_102 = arith.constant 3 : index
    %c0_103 = arith.constant 0 : index
    %c0_104 = arith.constant 0 : index
    %132 = vector.load %arg6[%c3_102, %c0_103, %c0_104] : memref<4x64x64xbf16, #tpu.memory_space<vmem>>, vector<1x64x64xbf16>
    %133 = vector.shape_cast %132 : vector<1x64x64xbf16> to vector<64x64xbf16>
    %cst_105 = arith.constant dense<0.000000e+00> : vector<16x64xf32>
    %134 = tpu.matmul %131, %133, %cst_105 {dimension_numbers = #tpu.dot_dimension_numbers<[1], [0], [0], [1], [0, 0, 1, 1], [], []>} : vector<16x64xbf16>, vector<64x64xbf16>, vector<16x64xf32> -> vector<16x64xf32>
    %c3_106 = arith.constant 3 : index
    %c0_107 = arith.constant 0 : index
    %c0_108 = arith.constant 0 : index
    %135 = vector.load %arg7[%c3_106, %c0_107, %c0_108] : memref<4x1x64xf32, #tpu.memory_space<vmem>>, vector<1x1x64xf32>
    %136 = vector.shape_cast %135 : vector<1x1x64xf32> to vector<1x64xf32>
    %137 = vector.broadcast %136 : vector<1x64xf32> to vector<16x64xf32>
    %138 = arith.addf %134, %137 : vector<16x64xf32>
    %139 = arith.addf %138, %113 : vector<16x64xf32>
    %cst_109 = arith.constant 0.000000e+00 : f32
    %140 = vector.broadcast %cst_109 : f32 to vector<16x64xf32>
    %141 = arith.maximumf %139, %140 : vector<16x64xf32>
    %142 = arith.truncf %141 : vector<16x64xf32> to vector<16x64xbf16>
    %c0_110 = arith.constant 0 : index
    %c0_111 = arith.constant 0 : index
    %143 = vector.load %arg8[%c0_110, %c0_111] : memref<64x64xbf16, #tpu.memory_space<vmem>>, vector<64x64xbf16>
    %cst_112 = arith.constant dense<0.000000e+00> : vector<16x64xf32>
    %144 = tpu.matmul %142, %143, %cst_112 {dimension_numbers = #tpu.dot_dimension_numbers<[1], [0], [0], [1], [0, 0, 1, 1], [], []>} : vector<16x64xbf16>, vector<64x64xbf16>, vector<16x64xf32> -> vector<16x64xf32>
    %c0_113 = arith.constant 0 : index
    %c0_114 = arith.constant 0 : index
    %145 = vector.load %arg9[%c0_113, %c0_114] : memref<1x64xf32, #tpu.memory_space<vmem>>, vector<1x64xf32>
    %146 = vector.broadcast %145 : vector<1x64xf32> to vector<16x64xf32>
    %147 = arith.addf %144, %146 : vector<16x64xf32>
    %c0_115 = arith.constant 0 : index
    %c0_116 = arith.constant 0 : index
    %c0_117 = arith.constant 0 : index
    %148 = vector.load %arg10[%c0_115, %c0_116, %c0_117] : memref<1x16x64xf32, #tpu.memory_space<vmem>>, vector<1x16x64xf32>
    %149 = vector.shape_cast %148 : vector<1x16x64xf32> to vector<16x64xf32>
    %150 = vector.shape_cast %147 : vector<16x64xf32> to vector<1x16x64xf32>
    tpu.vector_store %arg10[%c0_115, %c0_116, %c0_117], %150 {strides = array<i32>} : memref<1x16x64xf32, #tpu.memory_space<vmem>>, vector<1x16x64xf32>,
    return
  }
  func.func @transform_0(%arg0: i32) -> (i32, i32, i32) {
    %c0_i32 = arith.constant 0 : i32
    %c0_i32_0 = arith.constant 0 : i32
    %c0_i32_1 = arith.constant 0 : i32
    return %arg0, %c0_i32, %c0_i32_0 : i32, i32, i32
  }
  func.func @transform_1(%arg0: i32) -> (i32, i32) {
    %c0_i32 = arith.constant 0 : i32
    %c0_i32_0 = arith.constant 0 : i32
    %c0_i32_1 = arith.constant 0 : i32
    return %c0_i32, %c0_i32_0 : i32, i32
  }
  func.func @transform_2(%arg0: i32) -> (i32, i32) {
    %c0_i32 = arith.constant 0 : i32
    %c0_i32_0 = arith.constant 0 : i32
    %c0_i32_1 = arith.constant 0 : i32
    return %c0_i32, %c0_i32_0 : i32, i32
  }
  func.func @transform_3(%arg0: i32) -> (i32, i32, i32) {
    %c0_i32 = arith.constant 0 : i32
    %c0_i32_0 = arith.constant 0 : i32
    %c0_i32_1 = arith.constant 0 : i32
    %c0_i32_2 = arith.constant 0 : i32
    return %c0_i32, %c0_i32_0, %c0_i32_1 : i32, i32, i32
  }
  func.func @transform_4(%arg0: i32) -> (i32, i32, i32) {
    %c0_i32 = arith.constant 0 : i32
    %c0_i32_0 = arith.constant 0 : i32
    %c0_i32_1 = arith.constant 0 : i32
    %c0_i32_2 = arith.constant 0 : i32
    return %c0_i32, %c0_i32_0, %c0_i32_1 : i32, i32, i32
  }
  func.func @transform_5(%arg0: i32) -> (i32, i32, i32) {
    %c0_i32 = arith.constant 0 : i32
    %c0_i32_0 = arith.constant 0 : i32
    %c0_i32_1 = arith.constant 0 : i32
    %c0_i32_2 = arith.constant 0 : i32
    return %c0_i32, %c0_i32_0, %c0_i32_1 : i32, i32, i32
  }
  func.func @transform_6(%arg0: i32) -> (i32, i32, i32) {
    %c0_i32 = arith.constant 0 : i32
    %c0_i32_0 = arith.constant 0 : i32
    %c0_i32_1 = arith.constant 0 : i32
    %c0_i32_2 = arith.constant 0 : i32
    return %c0_i32, %c0_i32_0, %c0_i32_1 : i32, i32, i32
  }
  func.func @transform_7(%arg0: i32) -> (i32, i32) {
    %c0_i32 = arith.constant 0 : i32
    %c0_i32_0 = arith.constant 0 : i32
    %c0_i32_1 = arith.constant 0 : i32
    return %c0_i32, %c0_i32_0 : i32, i32
  }
  func.func @transform_8(%arg0: i32) -> (i32, i32) {
    %c0_i32 = arith.constant 0 : i32
    %c0_i32_0 = arith.constant 0 : i32
    %c0_i32_1 = arith.constant 0 : i32
    return %c0_i32, %c0_i32_0 : i32, i32
  }
  func.func @transform_9(%arg0: i32) -> (i32, i32, i32) {
    %c0_i32 = arith.constant 0 : i32
    %c0_i32_0 = arith.constant 0 : i32
    %c0_i32_1 = arith.constant 0 : i32
    return %arg0, %c0_i32, %c0_i32_0 : i32, i32, i32
  }
}

</mosaic_0001>

<bundles_post_ra>
// kernel: tpu_custom_call.1
= control target key start
LH: loop header
LB: loop body
LE: loop exit
PB: predicated region body
PF: predicated region fallthrough
CT: control target
= control target key end

     0   :  { %14 = vsyncpa [#allocation4], 0  ;;  %s4261_s0 = inlined_call_operand.vmem [shape: f32[2,64,4], index: 0, kind: input, shape index: {}]   ;;  %s4262_s1 = inlined_call_operand.vmem [shape: f32[4,64], index: 1, kind: input, shape index: {}]   ;;  %s4263_s2 = inlined_call_operand.vmem [shape: f32[1,64], index: 2, kind: input, shape index: {}]   ;;  %s4264_s3 = inlined_call_operand.vmem [shape: bf16[4,192,64], index: 3, kind: input, shape index: {}]   ;;  %s4265_s4 = inlined_call_operand.vmem [shape: f32[4,1,64], index: 4, kind: input, shape index: {}]   ;;  %s4266_s5 = inlined_call_operand.vmem [shape: bf16[4,64,64], index: 5, kind: input, shape index: {}]   ;;  %s4267_s6 = inlined_call_operand.vmem [shape: f32[4,1,64], index: 6, kind: input, shape index: {}]   ;;  %s4268_s7 = inlined_call_operand.vmem [shape: bf16[64,64], index: 7, kind: input, shape index: {}]   ;;  %s4269_s8 = inlined_call_operand.vmem [shape: f32[1,64], index: 8, kind: input, shape index: {}]   ;;  %s4270_s9 = inlined_call_operand.hbm [shape: f32[2,16,64], index: 9, kind: output, shape index: {}]  }
   0x1   :  { %16 = vsyncpa [#allocation4 + $0x1], 0  ;;  %s3425_s30 = smov 0   ;;  %s3427_s10 = smov 0  }
   0x2   :  { %s3429_s11 = smov 0   ;;  %s3431_s12 = smov 0  }
   0x3 LB: > { %s3446_s13 = sadd.s32 4294967295, %s3362_s12   ;;  %s2785_s14 = sadd.s32 4294967294, %s3362_s12   ;;  %s3362_s12 = sphi %s3431_s12, %s4276_s12   ;;  %s3358_s11 = sphi %s3429_s11, %s4275_s11   ;;  %s3354_s10 = sphi %s3427_s10, %s4274_s10   ;;  %s3350_s30 = sphi %s3425_s30, %s4273_s30  }
   0x4   : > { %s3450_s15 = sadd.s32 1, %s3362_s12   ;;  %s223_s16 = sadd.s32 1, %s3358_s11 }
   0x5   : > { %s220_s17 = ssub.s32 %s3362_s12, %s3450_s15  ;;  %p233_p0 = scmp.ne.s32.totalorder %s3358_s11, %s3354_s10 }
   0x6   : > { %p221_p1 = scmp.eq.s32.totalorder %s220_s17, 0  ;;  %p234_p2 = scmp.eq.s32.totalorder %s3446_s13, 1 }
   0x7   : > { %p239_p3 = scmp.ne.s32.totalorder %s3354_s10, %s3350_s30  ;;  %p240_p4 = scmp.eq.s32.totalorder %s2785_s14, 1 }
   0x8   : > { %s3461_s18 = scalar_select %p221_p1, %s3358_s11, %s223_s16  }
   0x9   : > { %p3463_p5 = por %p234_p2, %p233_p0  ;;  %p3467_p6 = por %p240_p4, %p239_p3 }
   0xa   : > { %p2788_p7 = scmp.ge.s32.totalorder %s3362_s12, 1  ;;  %p290_p8 = scmp.lt.s32.totalorder %s3362_s12, 3 }
   0xc   : > { %p291_p9 = pnand %p2788_p7, %p290_p8 }
   0xd   : > { %p326_p10 = scmp.lt.s32.totalorder (!%p291_p9), %s3446_s13, 1  ;;  %v3364_v0 = vmov (!%p291_p9), 1   ;;  %v3365_v1 = vmov (!%p291_p9), 0   ;;  %v3366_v4 = vmov (!%p291_p9), 2   ;;  %vm576_vm0 = vcmask (!%p291_p9), 516096   ;;  %v3232_v13 = vld [vmem:[%s4264_s3] sm:$0xff] (!%p291_p9)  }
   0xe   : > { %294 = sbr.rel (%p291_p9) target bundleno = 2814 (0xafe), region = 56  ;;  %3156 = vset.pattern.permute.xlu1 (!%p291_p9), %v3364_v0  ;;  %3155 = vset.pattern.permute.xlu0 (!%p291_p9), %v3365_v1  ;;  %vm968_vm1 = vcmask (!%p291_p9), 517120   ;;  %v3367_v6 = vmov (!%p291_p9), 0.0   ;;  %v3368_v7 = vmov (!%p291_p9), 3   ;;  %v3233_v14 = vld [vmem:[%s4264_s3 + $0x8] sm:$0xff] (!%p291_p9)   ;;  %v3234_v15 = vld [vmem:[%s4264_s3 + $0x10] sm:$0xff] (!%p291_p9)  }
   0xf   : > { %767 = vmatprep.subr.bf16.mxu0 (!%p291_p9), %v3365_v1  ;;  %577 = vst.msk [vmem:[#allocation2] sm:$0x1] (!%p291_p9), %vm576_vm0, %v3367_v6  ;;  %578 = vst.msk [vmem:[#allocation2 + $0x41] sm:$0x1] (!%p291_p9), %vm576_vm0, %v3367_v6  ;;  %v3235_v16 = vld [vmem:[%s4264_s3 + $0x18] sm:$0xff] (!%p291_p9)   ;;  %v3236_v17 = vld [vmem:[%s4264_s3 + $0x20] sm:$0xff] (!%p291_p9)  }
  0x10   : > { %970 = vst.msk [vmem:[#allocation2 + $0x42] sm:$0x3] (!%p291_p9), %vm968_vm1, %v3367_v6  ;;  %768 = vmatpush1.bf16.msra.mxu0 (!%p291_p9), %v3232_v13  ;;  %v3237_v18 = vld [vmem:[%s4264_s3 + $0x28] sm:$0xff] (!%p291_p9)   ;;  %v3238_v19 = vld [vmem:[%s4264_s3 + $0x30] sm:$0xff] (!%p291_p9)   ;;  %v3239_v20 = vld [vmem:[%s4264_s3 + $0x38] sm:$0xff] (!%p291_p9)   ;;  %vm579_vm2 = vcmask (!%p291_p9), 523264  }
  0x11   : > { %769 = vmatprep.subr.bf16.mxu0 (!%p291_p9), %v3365_v1  ;;  %v3240_v23 = vld [vmem:[%s4264_s3 + $0x40] sm:$0xff] (!%p291_p9)   ;;  %v3241_v28 = vld [vmem:[%s4264_s3 + $0x48] sm:$0xff] (!%p291_p9)   ;;  %v3242_v35 = vld [vmem:[%s4264_s3 + $0x50] sm:$0xff] (!%p291_p9)   ;;  %s3369_s24 = smov (!%p291_p9), 64   ;;  %vm1763_vm3 = vcmask (!%p291_p9), 519168   ;;  %vm1798_vm4 = vcmask (!%p291_p9), 1041409  }
  0x12   : > { %v3540_v24 = vld [vmem:[%s4262_s1] ss:$0 sm:$0xff] (!%p291_p9)  ;;  %v3556_v30 = vld [vmem:[%s4262_s1 + $0x1] ss:$0 sm:$0xff] (!%p291_p9)  ;;  %v3561_v31 = vld [vmem:[%s4262_s1 + $0x2] ss:$0 sm:$0xff] (!%p291_p9) }
  0x13   : > { %v3550_v29 = vld [vmem:[%s4263_s2] ss:$0 sm:$0xff] (!%p291_p9)  ;;  %v3573_v38 = vld [vmem:[%s4262_s1 + $0x3] ss:$0 sm:$0xff] (!%p291_p9)  ;;  %v3243_v53 = vld [vmem:[%s4264_s3 + $0x58] sm:$0xff] (!%p291_p9)   ;;  %vm1800_vm5 = vcmask (!%p291_p9), 1042434  }
  0x14   : > { %770 = vmatpush1.bf16.msra.mxu0 (!%p291_p9), %v3233_v14  ;;  %vm1802_vm6 = vcmask (!%p291_p9), 1043459   ;;  %vm1804_vm7 = vcmask (!%p291_p9), 1044484   ;;  %vm1806_vm8 = vcmask (!%p291_p9), 1045509   ;;  %vm1808_vm9 = vcmask (!%p291_p9), 1046534   ;;  %s323_s14 = sand.u32 (!%p291_p9), 1, %s3354_s10   ;;  %s3372_s29 = smov (!%p291_p9), [#allocation3]  }
  0x15   : > { %s327_s21 = scalar_select %p326_p10, %s3446_s13, 1  ;;  %771 = vmatprep.subr.bf16.mxu0 %v3365_v1  ;;  %vm1810_vm10 = vcmask 1047559   ;;  %vm3371_vm11 = vmmov 0  }
  0x16   : > { %s2789_s16 = sshll.u32 %s323_s14, 4 }
  0x17   : > { %s3004_s22 = sshll.u32 %s327_s21, 6 }
  0x18   : > { %s3481_s25 = scalar_lea.vmem %s4261_s0, %s3004_s22  ;;  %772 = vmatpush1.bf16.msra.mxu0 %v3234_v15  ;;  %s325_s22 = scalar_lea.vmem [#allocation3], %s2789_s16 }
  0x19   : > { %v332_v2 = vld [vmem:[%s3481_s25] sm:$0xff]  ;;  %v333_v3 = vld [vmem:[%s3481_s25 + $0x8] sm:$0xff]  ;;  %v335_v5 = vld [vmem:[%s3481_s25 + $0x18] sm:$0xff]  ;;  %773 = vmatprep.subr.bf16.mxu0 %v3365_v1  ;;  %s2723_s23 = sshll.u32 %s325_s22, 4  ;;  %s3304_s16 = sshll.u32 %s3372_s29, 4  ;;  %s4211_s23 = int_to_ptr.vmem [resolvable:$true] %s2723_s23  ;;  %s3305_s16 = int_to_ptr.vmem [resolvable:$false] %s3304_s16 }
  0x1a   : > { %411 = vperm.xlu1 %3156, %v332_v2   ;;  %351 = vperm.xlu0 %3155, %v332_v2   ;;  %v334_v8 = vld [vmem:[%s3481_s25 + $0x10] sm:$0xff]  ;;  %v337_v9 = vld [vmem:[%s3481_s25 + $0x28] sm:$0xff]  ;;  %v336_v10 = vld [vmem:[%s3481_s25 + $0x20] sm:$0xff]  ;;  %s3306_s17 = scalar_lea.vmem %s3305_s16, 512  ;;  %p3307_p0 = scmp.lt.s32.totalorder %s4211_s23, %s3305_s16 }
  0x1b   : > { %v339_v11 = vld [vmem:[%s3481_s25 + $0x38] sm:$0xff]  ;;  %v338_v12 = vld [vmem:[%s3481_s25 + $0x30] sm:$0xff]  ;;  %s3005_s25 = sshll.u32 %s3446_s13, 8  ;;  %s4220_s13 = scalar_lea.sflag [#allocation4], %s323_s14 }
  0x1c   : > { %774 = vmatpush1.bf16.msra.mxu0 %v3235_v16  ;;  %s4217_s28 = scalar_lea.hbm %s4270_s9, %s3005_s25 }
  0x1d   : > { %775 = vmatprep.subr.bf16.mxu0 %v3365_v1 }
  0x1e   : > { %415 = vperm.xlu1 %3156, %v333_v3   ;;  %356 = vperm.xlu0 %3155, %v333_v3  }
  0x20   : > { %776 = vmatpush1.bf16.msra.mxu0 %v3236_v17 }
  0x21   : > { %777 = vmatprep.subr.bf16.mxu0 %v3365_v1 }
  0x22   : > { %3158 = vset.pattern.permute.xlu1 %v3366_v4  ;;  %3157 = vset.pattern.permute.xlu0 %v3366_v4 }
  0x23   : > { %468 = vperm.xlu1 %3158, %v333_v3   ;;  %464 = vperm.xlu0 %3157, %v332_v2  }
  0x24   : > { %778 = vmatpush1.bf16.msra.mxu0 %v3237_v18 }
  0x25   : > { %779 = vmatprep.subr.bf16.mxu0 %v3365_v1 }
  0x27   : > { %3159 = vset.pattern.permute.xlu1 %v3368_v7  ;;  %476 = vperm.xlu0 %3157, %v335_v5  }
  0x28   : > { %517 = vperm.xlu1 %3159, %v332_v2   ;;  %780 = vmatpush1.bf16.msra.mxu0 %v3238_v19 }
  0x29   : > { %781 = vmatprep.subr.bf16.mxu0 %v3365_v1 }
  0x2b   : > { %3163 = vset.pattern.permute.xlu0 %v3364_v0 }
  0x2c   : > { %3160 = vset.pattern.permute.xlu1 %v3365_v1  ;;  %419 = vperm.xlu0 %3163, %v334_v8  }
  0x2d   : > { %361 = vperm.xlu1 %3160, %v334_v8   ;;  %782 = vmatpush1.bf16.msra.mxu0 %v3239_v20 }
  0x2e   : > { %783 = vmatprep.subr.bf16.mxu0 %v3365_v1 }
  0x30   : > { %431 = vperm.xlu0 %3163, %v337_v9  }
  0x31   : > { %366 = vperm.xlu1 %3160, %v335_v5   ;;  %784 = vmatpush1.bf16.msra.mxu0 %v3240_v23 }
  0x32   : > { %785 = vmatprep.subr.bf16.mxu0 %v3365_v1 }
  0x34   : > { %3167 = vset.pattern.permute.xlu0 %v3368_v7 }
  0x35   : > { %3161 = vset.pattern.permute.xlu1 %v3364_v0  ;;  %521 = vperm.xlu0 %3167, %v333_v3  }
  0x36   : > { %423 = vperm.xlu1 %3161, %v335_v5   ;;  %786 = vmatpush1.bf16.msra.mxu0 %v3241_v28 }
  0x37   : > { %787 = vmatprep.subr.bf16.mxu0 %v3365_v1 }
  0x39   : > { %533 = vperm.xlu0 %3167, %v336_v10  }
  0x3a   : > { %3162 = vset.pattern.permute.xlu1 %v3366_v4  ;;  %788 = vmatpush1.bf16.msra.mxu0 %v3242_v35 }
  0x3b   : > { %472 = vperm.xlu1 %3162, %v334_v8   ;;  %789 = vmatprep.subr.bf16.mxu0 %v3365_v1 }
  0x3d   : > { %3169 = vset.pattern.permute.xlu0 %v3365_v1 }
  0x3e   : > { %371 = vperm.xlu0 %3169, %v336_v10   ;;  %790 = vmatpush1.bf16.msra.mxu0 %v3243_v53 }
  0x3f   : > { %3164 = vset.pattern.permute.xlu1 %v3368_v7 }
  0x40   : > { %525 = vperm.xlu1 %3164, %v334_v8  }
  0x42   : > { %386 = vperm.xlu0 %3169, %v339_v11  }
  0x44   : > { %529 = vperm.xlu1 %3164, %v335_v5  }
  0x46   : > { %3173 = vset.pattern.permute.xlu0 %v3366_v4 }
  0x47   : > { %488 = vperm.xlu0 %3173, %v338_v12  }
  0x48   : > { %3165 = vset.pattern.permute.xlu1 %v3365_v1 }
  0x49   : > { %376 = vperm.xlu1 %3165, %v337_v9  }
  0x4b   : > { %3176 = vset.pattern.permute.xlu0 %v3368_v7 }
  0x4c   : > { %545 = vperm.xlu0 %3176, %v339_v11  }
  0x4d   : > { %3166 = vset.pattern.permute.xlu1 %v3364_v0 }
  0x4e   : > { %427 = vperm.xlu1 %3166, %v336_v10  }
  0x52   : > { %3168 = vset.pattern.permute.xlu1 %v3366_v4 }
  0x53   : > { %480 = vperm.xlu1 %3168, %v336_v10  }
  0x57   : > { %484 = vperm.xlu1 %3168, %v337_v9  }
  0x5b   : > { %3170 = vset.pattern.permute.xlu1 %v3368_v7 }
  0x5c   : > { %537 = vperm.xlu1 %3170, %v337_v9  }
  0x60   : > { %3171 = vset.pattern.permute.xlu1 %v3365_v1 }
  0x61   : > { %381 = vperm.xlu1 %3171, %v338_v12  }
  0x65   : > { %3172 = vset.pattern.permute.xlu1 %v3364_v0 }
  0x66   : > { %435 = vperm.xlu1 %3172, %v338_v12  }
  0x6a   : > { %439 = vperm.xlu1 %3172, %v339_v11  }
  0x6e   : > { %3174 = vset.pattern.permute.xlu1 %v3366_v4 }
  0x6f   : > { %492 = vperm.xlu1 %3174, %v339_v11  }
  0x73   : > { %3175 = vset.pattern.permute.xlu1 %v3368_v7 }
  0x74   : > { %541 = vperm.xlu1 %3175, %v338_v12  }
  0x99   : > { %v412_v21 = vpop.permute.xlu1 %411  ;;  %v352_v22 = vpop.permute.xlu0 %351 }
  0x9a   : > { %v393_v27 = vmul.f32 %v3540_v24, %v352_v22  ;;  %v446_v36 = vmul.f32 %v3556_v30, %v412_v21 }
  0x9c   : > { %v401_v32 = vadd.f32 %v3550_v29, %v393_v27 }
  0x9d   : > { %v416_v25 = vpop.permute.xlu1 %415  ;;  %v357_v26 = vpop.permute.xlu0 %356 }
  0x9e   : > { %v454_v39 = vadd.f32 %v446_v36, %v401_v32  ;;  %v394_v44 = vmul.f32 %v3540_v24, %v357_v26  ;;  %v447_v50 = vmul.f32 %v3556_v30, %v416_v25 }
  0xa0   : > { %v402_v49 = vadd.f32 %v3550_v29, %v394_v44 }
  0xa2   : > { %v469_v33 = vpop.permute.xlu1 %468  ;;  %v465_v34 = vpop.permute.xlu0 %464  ;;  %v455_v54 = vadd.f32 %v447_v50, %v402_v49 }
  0xa3   : > { %v499_v37 = vmul.f32 %v3561_v31, %v465_v34  ;;  %v500_v55 = vmul.f32 %v3561_v31, %v469_v33 }
  0xa5   : > { %v507_v42 = vadd.f32 %v499_v37, %v454_v39  ;;  %v508_v57 = vadd.f32 %v500_v55, %v455_v54 }
  0xa6   : > { %v477_v40 = vpop.permute.xlu0 %476 }
  0xa7   : > { %v518_v41 = vpop.permute.xlu1 %517  ;;  %v502_v12 = vmul.f32 %v3561_v31, %v477_v40 }
  0xa8   : > { %v552_v43 = vmul.f32 %v3573_v38, %v518_v41 }
  0xaa   : > { %v560_v45 = vadd.f32 %v552_v43, %v507_v42 }
  0xab   : > { %v420_v46 = vpop.permute.xlu0 %419 }
  0xac   : > { %v3578_v47 = vmax.f32 %v560_v45, 0.0  ;;  %v362_v48 = vpop.permute.xlu1 %361  ;;  %v448_v2 = vmul.f32 %v3556_v30, %v420_v46 }
  0xad   : > { %v395_v61 = vmul.f32 %v3540_v24, %v362_v48 }
  0xae   : > { %580 = vst.msk [vmem:[#allocation2 + $0x1] sm:$0xff] %vm579_vm2, %v3578_v47 }
  0xaf   : > { %v432_v51 = vpop.permute.xlu0 %431  ;;  %v403_v0 = vadd.f32 %v3550_v29, %v395_v61 }
  0xb0   : > { %v367_v52 = vpop.permute.xlu1 %366  ;;  %v451_v45 = vmul.f32 %v3556_v30, %v432_v51 }
  0xb1   : > { %v396_v3 = vmul.f32 %v3540_v24, %v367_v52  ;;  %v456_v9 = vadd.f32 %v448_v2, %v403_v0 }
  0xb3   : > { %v404_v10 = vadd.f32 %v3550_v29, %v396_v3 }
  0xb4   : > { %v522_v56 = vpop.permute.xlu0 %521 }
  0xb5   : > { %v3588_v58 = vld [vmem:[#allocation2] sm:$0xff]  ;;  %v553_v59 = vmul.f32 %v3573_v38, %v522_v56  ;;  %v424_v60 = vpop.permute.xlu1 %423 }
  0xb6   : > { %969 = vst.msk [vmem:[#allocation2] sm:$0x3] %vm968_vm1, %v3367_v6  ;;  %v449_v7 = vmul.f32 %v3556_v30, %v424_v60 }
  0xb7   : > { %v561_v62 = vadd.f32 %v553_v59, %v508_v57 }
  0xb8   : > { %v457_v13 = vadd.f32 %v449_v7, %v404_v10  ;;  %v534_v17 = vpop.permute.xlu0 %533 }
  0xb9   : > { %v3594_v63 = vmax.f32 %v561_v62, 0.0  ;;  %v556_v41 = vmul.f32 %v3573_v38, %v534_v17 }
  0xba   : > { %v473_v4 = vpop.permute.xlu1 %472  ;;  %v510_v20 = vadd.f32 %v502_v12, %v457_v13 }
  0xbb   : > { %581 = vst.msk [vmem:[#allocation2 + $0x9] sm:$0xff] %vm579_vm2, %v3594_v63  ;;  %v3177_v5 = vpack.i.bf16 %v3594_v63, %v3578_v47  ;;  %v501_v8 = vmul.f32 %v3561_v31, %v473_v4 }
  0xbd   : > { %3178 = vrot.lane.b32.xlu1 %v3177_v5, %s3369_s24  ;;  %v509_v14 = vadd.f32 %v501_v8, %v456_v9  ;;  %v372_v26 = vpop.permute.xlu0 %371 }
  0xbe   : > { %v397_v28 = vmul.f32 %v3540_v24, %v372_v26 }
  0xbf   : > { %v526_v11 = vpop.permute.xlu1 %525 }
  0xc0   : > { %v554_v15 = vmul.f32 %v3573_v38, %v526_v11  ;;  %v405_v36 = vadd.f32 %v3550_v29, %v397_v28 }
  0xc1   : > { %v387_v60 = vpop.permute.xlu0 %386 }
  0xc2   : > { %v562_v16 = vadd.f32 %v554_v15, %v509_v14  ;;  %v596_v33 = vld [vmem:[#allocation2 + $0x2] sm:$0xff]  ;;  %v400_v2 = vmul.f32 %v3540_v24, %v387_v60 }
  0xc3   : > { %v530_v18 = vpop.permute.xlu1 %529 }
  0xc4   : > { %v3609_v19 = vmax.f32 %v562_v16, 0.0  ;;  %v555_v21 = vmul.f32 %v3573_v38, %v530_v18  ;;  %v408_v9 = vadd.f32 %v3550_v29, %v400_v2 }
  0xc6   : > { %582 = vst.msk [vmem:[#allocation2 + $0x11] sm:$0xff] %vm579_vm2, %v3609_v19  ;;  %v563_v22 = vadd.f32 %v555_v21, %v510_v20  ;;  %v489_v0 = vpop.permute.xlu0 %488 }
  0xc7   : > { %v505_v16 = vmul.f32 %v3561_v31, %v489_v0 }
  0xc8   : > { %v3614_v23 = vmax.f32 %v563_v22, 0.0  ;;  %v377_v25 = vpop.permute.xlu1 %376 }
  0xc9   : > { %v398_v39 = vmul.f32 %v3540_v24, %v377_v25 }
  0xca   : > { %583 = vst.msk [vmem:[#allocation2 + $0x19] sm:$0xff] %vm579_vm2, %v3614_v23  ;;  %v3182_v27 = vpack.i.bf16 %v3614_v23, %v3609_v19 }
  0xcb   : > { %v406_v46 = vadd.f32 %v3550_v29, %v398_v39  ;;  %v546_v8 = vpop.permute.xlu0 %545 }
  0xcc   : > { %3183 = vrot.lane.b32.xlu1 %v3182_v27, %s3369_s24  ;;  %v559_v14 = vmul.f32 %v3573_v38, %v546_v8 }
  0xcd   : > { %v428_v32 = vpop.permute.xlu1 %427  ;;  %v597_v34 = vld [vmem:[#allocation2 + $0xa] sm:$0xff]  ;;  %v459_v53 = vadd.f32 %v451_v45, %v406_v46 }
  0xce   : > { %v645_v35 = vpack.c.bf16 %v597_v34, %v596_v33  ;;  %v450_v37 = vmul.f32 %v3556_v30, %v428_v32 }
  0xd0   : > { %2810 = vmatprep.mubr.msk.bf16.mxu0 %vm579_vm2, %v645_v35  ;;  %v458_v42 = vadd.f32 %v450_v37, %v405_v36 }
  0xd1   : > { %v598_v35 = vld [vmem:[#allocation2 + $0x12] sm:$0xff] }
  0xd2   : > { %v481_v40 = vpop.permute.xlu1 %480 }
  0xd3   : > { %v503_v43 = vmul.f32 %v3561_v31, %v481_v40 }
  0xd5   : > { %v511_v44 = vadd.f32 %v503_v43, %v458_v42  ;;  %v591_v42 = vld [vmem:[#allocation2 + $0x18] sm:$0xff] }
  0xd6   : > { %v485_v48 = vpop.permute.xlu1 %484 }
  0xd7   : > { %v564_v49 = vadd.f32 %v556_v41, %v511_v44  ;;  %v504_v50 = vmul.f32 %v3561_v31, %v485_v48  ;;  %v590_v41 = vld [vmem:[#allocation2 + $0x10] sm:$0xff] }
  0xd9   : > { %v3631_v52 = vmax.f32 %v564_v49, 0.0  ;;  %v512_v55 = vadd.f32 %v504_v50, %v459_v53 }
  0xdb   : > { %584 = vst.msk [vmem:[#allocation2 + $0x21] sm:$0xff] %vm579_vm2, %v3631_v52  ;;  %v538_v54 = vpop.permute.xlu1 %537 }
  0xdc   : > { %v557_v56 = vmul.f32 %v3573_v38, %v538_v54 }
  0xde   : > { %v565_v57 = vadd.f32 %v557_v56, %v512_v55 }
  0xe0   : > { %v3636_v59 = vmax.f32 %v565_v57, 0.0  ;;  %v382_v51 = vpop.permute.xlu1 %381 }
  0xe1   : > { %v399_v4 = vmul.f32 %v3540_v24, %v382_v51 }
  0xe2   : > { %585 = vst.msk [vmem:[#allocation2 + $0x29] sm:$0xff] %vm579_vm2, %v3636_v59  ;;  %v3187_v61 = vpack.i.bf16 %v3636_v59, %v3631_v52  ;;  %v599_v28 = vld [vmem:[#allocation2 + $0x1a] sm:$0xff] }
  0xe3   : > { %v407_v10 = vadd.f32 %v3550_v29, %v399_v4  ;;  %v647_v36 = vpack.c.bf16 %v599_v28, %v598_v35  ;;  %v592_v54 = vld [vmem:[#allocation2 + $0x20] sm:$0xff] }
  0xe4   : > { %3188 = vrot.lane.b32.xlu0 %v3187_v61, %s3369_s24 }
  0xe5   : > { %v436_v62 = vpop.permute.xlu1 %435 }
  0xe6   : > { %v452_v7 = vmul.f32 %v3556_v30, %v436_v62 }
  0xe8   : > { %v460_v15 = vadd.f32 %v452_v7, %v407_v10  ;;  %v3244_v10 = vld [vmem:[%s4266_s5] sm:$0xff]  }
  0xe9   : > { %v440_v3 = vpop.permute.xlu1 %439  ;;  %v593_v55 = vld [vmem:[#allocation2 + $0x28] sm:$0xff]  ;;  %3038 = vmatprep.subr.bf16.mxu1 %v3244_v10 }
  0xea   : > { %v453_v5 = vmul.f32 %v3556_v30, %v440_v3  ;;  %v513_v20 = vadd.f32 %v505_v16, %v460_v15  ;;  %3039 = vmatpush3.bf16.msra.mxu1 %v3244_v10 }
  0xec   : > { %v461_v12 = vadd.f32 %v453_v5, %v408_v9 }
  0xee   : > { %v493_v11 = vpop.permute.xlu1 %492 }
  0xef   : > { %v506_v13 = vmul.f32 %v3561_v31, %v493_v11  ;;  %v3245_v11 = vld [vmem:[%s4266_s5 + $0x8] sm:$0xff]  }
  0xf0   : > { %3040 = vmatprep.subr.bf16.mxu1 %v3245_v11 }
  0xf1   : > { %v514_v17 = vadd.f32 %v506_v13, %v461_v12  ;;  %3041 = vmatpush3.bf16.msra.mxu1 %v3245_v11  ;;  %v3246_v12 = vld [vmem:[%s4266_s5 + $0x10] sm:$0xff]   ;;  %v3247_v13 = vld [vmem:[%s4266_s5 + $0x18] sm:$0xff]  }
  0xf2   : > { %3042 = vmatprep.subr.bf16.mxu1 %v3246_v12 }
  0xf3   : > { %v567_v24 = vadd.f32 %v559_v14, %v514_v17  ;;  %v542_v18 = vpop.permute.xlu1 %541  ;;  %v2797_v14 = vld [vmem:[%s4265_s4] ss:$0 sm:$0xff] }
  0xf4   : > { %v558_v30 = vmul.f32 %v3573_v38, %v542_v18  ;;  %v589_v38 = vld [vmem:[#allocation2 + $0x8] sm:$0xff] }
  0xf5   : > { %v3653_v21 = vmax.f32 %v567_v24, 0.0  ;;  %3043 = vmatpush3.bf16.msra.mxu1 %v3246_v12 }
  0xf6   : > { %v566_v22 = vadd.f32 %v558_v30, %v513_v20  ;;  %3044 = vmatprep.subr.bf16.mxu1 %v3247_v13 }
  0xf7   : > { %587 = vst.msk [vmem:[#allocation2 + $0x39] sm:$0xff] %vm579_vm2, %v3653_v21 }
  0xf8   : > { %v3657_v29 = vmax.f32 %v566_v22, 0.0 }
  0xf9   : > { %3045 = vmatpush3.bf16.msra.mxu1 %v3247_v13 }
  0xfa   : > { %586 = vst.msk [vmem:[#allocation2 + $0x31] sm:$0xff] %vm579_vm2, %v3657_v29  ;;  %v3192_v31 = vpack.i.bf16 %v3653_v21, %v3657_v29  ;;  %1160 = vmatprep.subr.bf16.mxu1 %v3365_v1 }
  0xfc   : > { %3193 = vrot.lane.b32.xlu1 %v3192_v31, %s3369_s24 }
  0xfe   : > { %v603_v61 = vld [vmem:[#allocation2 + $0x3a] sm:$0xff] }
 0x101   : > { %v601_v43 = vld [vmem:[#allocation2 + $0x2a] sm:$0xff]  ;;  %v602_v56 = vld [vmem:[#allocation2 + $0x32] sm:$0xff] }
 0x102   : > { %v651_v62 = vpack.c.bf16 %v603_v61, %v602_v56  ;;  %v594_v4 = vld [vmem:[#allocation2 + $0x30] sm:$0xff]  ;;  %v595_v5 = vld [vmem:[#allocation2 + $0x38] sm:$0xff] }
 0x103   : > { %v3251_v61 = vld [vmem:[%s4264_s3 + $0x78] sm:$0xff]  }
 0x12f   : > { %v3179_v25 = vpop.permute.xlu1 %3178 }
 0x130   : > { %v3181_v26 = vunpack.i.h.bf16 %v3179_v25  ;;  %v3180_v27 = vunpack.i.l.bf16 %v3179_v25 }
 0x132   : > { %v636_v32 = vsel %vm579_vm2, %v3588_v58, %v3180_v27  ;;  %v637_v33 = vsel %vm579_vm2, %v589_v38, %v3181_v26  ;;  %v600_v58 = vld [vmem:[#allocation2 + $0x22] sm:$0xff] }
 0x133   : > { %v644_v34 = vpack.c.bf16 %v637_v33, %v636_v32  ;;  %v649_v48 = vpack.c.bf16 %v601_v43, %v600_v58 }
 0x135   : > { %800 = vmatmul.mubr.bf16.vlgmr.msra.gmra.mrb[0].mxu0 %v644_v34 }
 0x136   : > { %2811 = vmatprep.mubr.msk.bf16.mxu0 %vm579_vm2, %v647_v36 }
 0x13e   : > { %v3184_v37 = vpop.permute.xlu1 %3183 }
 0x13f   : > { %v3186_v39 = vunpack.i.h.bf16 %v3184_v37  ;;  %v3185_v40 = vunpack.i.l.bf16 %v3184_v37 }
 0x141   : > { %v638_v44 = vsel %vm579_vm2, %v590_v41, %v3185_v40  ;;  %v639_v45 = vsel %vm579_vm2, %v591_v42, %v3186_v39 }
 0x142   : > { %v646_v46 = vpack.c.bf16 %v639_v45, %v638_v44 }
 0x144   : > { %808 = vmatmul.mubr.bf16.gmra.mrb[4].mxu0 %v646_v46 }
 0x145   : > { %2812 = vmatprep.mubr.msk.bf16.mxu0 %vm579_vm2, %v649_v48 }
 0x156   : > { %v3189_v49 = vpop.permute.xlu0 %3188 }
 0x157   : > { %v3191_v50 = vunpack.i.h.bf16 %v3189_v49  ;;  %v3190_v53 = vunpack.i.l.bf16 %v3189_v49 }
 0x159   : > { %v640_v57 = vsel %vm579_vm2, %v592_v54, %v3190_v53  ;;  %v641_v51 = vsel %vm579_vm2, %v593_v55, %v3191_v50 }
 0x15a   : > { %v648_v60 = vpack.c.bf16 %v641_v51, %v640_v57  ;;  %v3248_v57 = vld [vmem:[%s4264_s3 + $0x60] sm:$0xff]   ;;  %v3249_v51 = vld [vmem:[%s4264_s3 + $0x68] sm:$0xff]  }
 0x15c   : > { %816 = vmatmul.mubr.bf16.gmra.mrb[8].mxu0 %v648_v60  ;;  %v3250_v60 = vld [vmem:[%s4264_s3 + $0x70] sm:$0xff]  }
 0x15d   : > { %2813 = vmatprep.mubr.msk.bf16.mxu0 %vm579_vm2, %v651_v62  ;;  %v3252_v62 = vld [vmem:[%s4264_s3 + $0x80] sm:$0xff]  }
 0x16e   : > { %v3194_v0 = vpop.permute.xlu1 %3193 }
 0x16f   : > { %v3196_v2 = vunpack.i.h.bf16 %v3194_v0  ;;  %v3195_v3 = vunpack.i.l.bf16 %v3194_v0  ;;  %v3253_v0 = vld [vmem:[%s4264_s3 + $0x88] sm:$0xff]  }
 0x171   : > { %v642_v7 = vsel %vm579_vm2, %v594_v4, %v3195_v3  ;;  %v643_v8 = vsel %vm579_vm2, %v595_v5, %v3196_v2  ;;  %v3254_v2 = vld [vmem:[%s4264_s3 + $0x90] sm:$0xff]   ;;  %v3255_v3 = vld [vmem:[%s4264_s3 + $0x98] sm:$0xff]   ;;  %v3256_v4 = vld [vmem:[%s4264_s3 + $0xa0] sm:$0xff]  }
 0x172   : > { %v650_v9 = vpack.c.bf16 %v643_v8, %v642_v7  ;;  %v3257_v5 = vld [vmem:[%s4264_s3 + $0xa8] sm:$0xff]   ;;  %v3258_v7 = vld [vmem:[%s4264_s3 + $0xb0] sm:$0xff]   ;;  %v2814_v8 = vld [vmem:[%s4267_s6] ss:$0 sm:$0xff] }
 0x174   : > { %824 = vmatmul.mubr.bf16.gmra.mrb[12].mxu0 %v650_v9  ;;  %v3259_v9 = vld [vmem:[%s4264_s3 + $0xb8] sm:$0xff]  }
 0x208   : > { %v801_v15 = vpop.f32.mrb[0].mxu0 }
 0x209   : > { %v802_v16 = vadd.f32 %v2797_v14, %v801_v15  ;;  %v803_v17 = vpop.f32.mrb[1].mxu0 }
 0x20a   : > { %v804_v24 = vpop.f32.mrb[2].mxu0 }
 0x20b   : > { %v805_v18 = vadd.f32 %v2797_v14, %v804_v24  ;;  %v806_v20 = vpop.f32.mrb[3].mxu0  ;;  %v832_v30 = vmax.f32 %v802_v16, 0.0 }
 0x20d   : > { %v833_v22 = vmax.f32 %v805_v18, 0.0 }
 0x20f   : > { %v840_v31 = vpack.c.bf16 %v833_v22, %v832_v30 }
 0x211   : > { %3046 = vmatprep.mubr.msk.bf16.mxu1 %vm579_vm2, %v840_v31 }
 0x217   : > { %v809_v25 = vpop.f32.mrb[4].mxu0 }
 0x218   : > { %v810_v26 = vadd.f32 %v2797_v14, %v809_v25  ;;  %v811_v27 = vpop.f32.mrb[5].mxu0 }
 0x219   : > { %v812_v38 = vpop.f32.mrb[6].mxu0 }
 0x21a   : > { %v813_v28 = vadd.f32 %v2797_v14, %v812_v38  ;;  %v814_v32 = vpop.f32.mrb[7].mxu0  ;;  %v834_v33 = vmax.f32 %v810_v26, 0.0 }
 0x21c   : > { %v835_v34 = vmax.f32 %v813_v28, 0.0 }
 0x21e   : > { %v841_v35 = vpack.c.bf16 %v835_v34, %v834_v33 }
 0x220   : > { %3047 = vmatmul.mubr.msk.bf16.vlgmr.msra.gmra.mrb[0].mxu1 %vm579_vm2, %v841_v35 }
 0x221   : > { %1161 = vmatpush1.bf16.msra.mxu1 %v3248_v57 }
 0x222   : > { %1162 = vmatprep.subr.bf16.mxu1 %v3365_v1 }
 0x225   : > { %1163 = vmatpush1.bf16.msra.mxu1 %v3249_v51 }
 0x226   : > { %1164 = vmatprep.subr.bf16.mxu1 %v3365_v1 }
 0x229   : > { %1165 = vmatpush1.bf16.msra.mxu1 %v3250_v60 }
 0x22a   : > { %1166 = vmatprep.subr.bf16.mxu1 %v3365_v1 }
 0x22d   : > { %1167 = vmatpush1.bf16.msra.mxu1 %v3251_v61 }
 0x22e   : > { %1168 = vmatprep.subr.bf16.mxu1 %v3365_v1 }
 0x22f   : > { %v817_v36 = vpop.f32.mrb[8].mxu0 }
 0x230   : > { %v818_v37 = vadd.f32 %v2797_v14, %v817_v36  ;;  %v819_v39 = vpop.f32.mrb[9].mxu0 }
 0x231   : > { %v820_v40 = vpop.f32.mrb[10].mxu0  ;;  %1169 = vmatpush1.bf16.msra.mxu1 %v3252_v62 }
 0x232   : > { %v821_v41 = vadd.f32 %v2797_v14, %v820_v40  ;;  %v822_v42 = vpop.f32.mrb[11].mxu0  ;;  %v836_v43 = vmax.f32 %v818_v37, 0.0  ;;  %1170 = vmatprep.subr.bf16.mxu1 %v3365_v1 }
 0x234   : > { %v837_v44 = vmax.f32 %v821_v41, 0.0 }
 0x235   : > { %1171 = vmatpush1.bf16.msra.mxu1 %v3253_v0 }
 0x236   : > { %v842_v45 = vpack.c.bf16 %v837_v44, %v836_v43  ;;  %1172 = vmatprep.subr.bf16.mxu1 %v3365_v1 }
 0x238   : > { %3050 = vmatprep.mubr.msk.bf16.mxu1 %vm579_vm2, %v842_v45 }
 0x239   : > { %1173 = vmatpush1.bf16.msra.mxu1 %v3254_v2 }
 0x23a   : > { %1174 = vmatprep.subr.bf16.mxu1 %v3365_v1 }
 0x23d   : > { %1175 = vmatpush1.bf16.msra.mxu1 %v3255_v3 }
 0x23e   : > { %1176 = vmatprep.subr.bf16.mxu1 %v3365_v1 }
 0x241   : > { %1177 = vmatpush1.bf16.msra.mxu1 %v3256_v4 }
 0x242   : > { %1178 = vmatprep.subr.bf16.mxu1 %v3365_v1 }
 0x245   : > { %1179 = vmatpush1.bf16.msra.mxu1 %v3257_v5 }
 0x246   : > { %1180 = vmatprep.subr.bf16.mxu1 %v3365_v1 }
 0x247   : > { %v825_v46 = vpop.f32.mrb[12].mxu0 }
 0x248   : > { %v826_v58 = vadd.f32 %v2797_v14, %v825_v46  ;;  %v827_v48 = vpop.f32.mrb[13].mxu0 }
 0x249   : > { %v828_v49 = vpop.f32.mrb[14].mxu0  ;;  %1181 = vmatpush1.bf16.msra.mxu1 %v3258_v7 }
 0x24a   : > { %v829_v50 = vadd.f32 %v2797_v14, %v828_v49  ;;  %v830_v53 = vpop.f32.mrb[15].mxu0  ;;  %v838_v54 = vmax.f32 %v826_v58, 0.0  ;;  %1182 = vmatprep.subr.bf16.mxu1 %v3365_v1 }
 0x24c   : > { %v839_v55 = vmax.f32 %v829_v50, 0.0 }
 0x24d   : > { %1183 = vmatpush1.bf16.msra.mxu1 %v3259_v9 }
 0x24e   : > { %v843_v56 = vpack.c.bf16 %v839_v55, %v838_v54  ;;  %1977 = vmatprep.subr.bf16.mxu1 %v3365_v1 }
 0x250   : > { %3051 = vmatmul.mubr.msk.bf16.gmra.mrb[4].mxu1 %vm579_vm2, %v843_v56 }
 0x2f3   : > { %v3048_v10 = vpop.f32.mrb[0].mxu1 }
 0x2f4   : > { %v938_v11 = vadd.f32 %v3048_v10, %v2814_v8  ;;  %v929_v12 = vpop.f32.mrb[1].mxu1 }
 0x2f5   : > { %v930_v13 = vadd.f32 %v2814_v8, %v929_v12  ;;  %v3049_v14 = vpop.f32.mrb[2].mxu1 }
 0x2f6   : > { %v3748_v15 = vadd.f32 %v938_v11, %v3609_v19  ;;  %v941_v16 = vadd.f32 %v3049_v14, %v2814_v8  ;;  %v932_v17 = vpop.f32.mrb[3].mxu1 }
 0x2f7   : > { %v3751_v24 = vadd.f32 %v930_v13, %v3578_v47  ;;  %v933_v18 = vadd.f32 %v2814_v8, %v932_v17 }
 0x2f8   : > { %973 = vst.msk [vmem:[#allocation2 + $0x12] sm:$0xff] %vm579_vm2, %v3748_v15  ;;  %v3756_v20 = vadd.f32 %v941_v16, %v3614_v23 }
 0x2f9   : > { %971 = vst.msk [vmem:[#allocation2 + $0x2] sm:$0xff] %vm579_vm2, %v3751_v24  ;;  %v3761_v30 = vadd.f32 %v933_v18, %v3594_v63 }
 0x2fa   : > { %974 = vst.msk [vmem:[#allocation2 + $0x1a] sm:$0xff] %vm579_vm2, %v3756_v20  ;;  %v3202_v47 = vpack.i.bf16 %v3756_v20, %v3748_v15 }
 0x2fb   : > { %972 = vst.msk [vmem:[#allocation2 + $0xa] sm:$0xff] %vm579_vm2, %v3761_v30  ;;  %v3197_v19 = vpack.i.bf16 %v3761_v30, %v3751_v24 }
 0x2fc   : > { %3203 = vrot.lane.b32.xlu1 %v3202_v47, %s3369_s24 }
 0x2fd   : > { %3198 = vrot.lane.b32.xlu0 %v3197_v19, %s3369_s24 }
 0x300   : > { %v979_v23 = vld [vmem:[#allocation2] sm:$0xff] }
 0x301   : > { %1764 = vst.msk [vmem:[#allocation2] sm:$0xf] %vm1763_vm3, %v3367_v6  ;;  %v989_v49 = vld [vmem:[#allocation2 + $0x14] sm:$0xff] }
 0x302   : > { %v987_v63 = vld [vmem:[#allocation2 + $0x4] sm:$0xff]  ;;  %v988_v22 = vld [vmem:[#allocation2 + $0xc] sm:$0xff]  ;;  %v982_v56 = vld [vmem:[#allocation2 + $0x18] sm:$0xff] }
 0x303   : > { %v1036_v31 = vpack.c.bf16 %v988_v22, %v987_v63  ;;  %v980_v44 = vld [vmem:[#allocation2 + $0x8] sm:$0xff]  ;;  %v981_v55 = vld [vmem:[#allocation2 + $0x10] sm:$0xff] }
 0x304   : > { %v3261_v63 = vld [vmem:[%s4266_s5 + $0x28] sm:$0xff]   ;;  %v3262_v22 = vld [vmem:[%s4266_s5 + $0x30] sm:$0xff]  }
 0x305   : > { %2861 = vmatprep.mubr.msk.bf16.mxu1 %vm579_vm2, %v1036_v31  ;;  %v3263_v31 = vld [vmem:[%s4266_s5 + $0x38] sm:$0xff]  }
 0x323   : > { %v3052_v25 = vpop.f32.mrb[4].mxu1 }
 0x324   : > { %v954_v26 = vadd.f32 %v3052_v25, %v2814_v8  ;;  %v945_v27 = vpop.f32.mrb[5].mxu1  ;;  %v2848_v25 = vld [vmem:[%s4265_s4 + $0x1] ss:$0 sm:$0xff] }
 0x325   : > { %v946_v38 = vadd.f32 %v2814_v8, %v945_v27  ;;  %v3053_v28 = vpop.f32.mrb[6].mxu1 }
 0x326   : > { %v3777_v32 = vadd.f32 %v954_v26, %v3657_v29  ;;  %v957_v33 = vadd.f32 %v3053_v28, %v2814_v8  ;;  %v948_v34 = vpop.f32.mrb[7].mxu1 }
 0x327   : > { %v3780_v35 = vadd.f32 %v946_v38, %v3631_v52  ;;  %v949_v36 = vadd.f32 %v2814_v8, %v948_v34 }
 0x328   : > { %977 = vst.msk [vmem:[#allocation2 + $0x32] sm:$0xff] %vm579_vm2, %v3777_v32  ;;  %v3785_v37 = vadd.f32 %v957_v33, %v3653_v21 }
 0x329   : > { %975 = vst.msk [vmem:[#allocation2 + $0x22] sm:$0xff] %vm579_vm2, %v3780_v35  ;;  %v3790_v39 = vadd.f32 %v949_v36, %v3636_v59 }
 0x32a   : > { %978 = vst.msk [vmem:[#allocation2 + $0x3a] sm:$0xff] %vm579_vm2, %v3785_v37  ;;  %v3212_v52 = vpack.i.bf16 %v3785_v37, %v3777_v32 }
 0x32b   : > { %976 = vst.msk [vmem:[#allocation2 + $0x2a] sm:$0xff] %vm579_vm2, %v3790_v39  ;;  %v3207_v29 = vpack.i.bf16 %v3790_v39, %v3780_v35 }
 0x32c   : > { %3213 = vrot.lane.b32.xlu1 %v3212_v52, %s3369_s24 }
 0x32d   : > { %3208 = vrot.lane.b32.xlu0 %v3207_v29, %s3369_s24 }
 0x330   : > { %v983_v40 = vld [vmem:[#allocation2 + $0x20] sm:$0xff] }
 0x331   : > { %v990_v45 = vld [vmem:[#allocation2 + $0x1c] sm:$0xff]  ;;  %v993_v7 = vld [vmem:[#allocation2 + $0x34] sm:$0xff] }
 0x332   : > { %v991_v21 = vld [vmem:[#allocation2 + $0x24] sm:$0xff]  ;;  %v1038_v54 = vpack.c.bf16 %v990_v45, %v989_v49  ;;  %v992_v60 = vld [vmem:[#allocation2 + $0x2c] sm:$0xff]  ;;  %v994_v8 = vld [vmem:[#allocation2 + $0x3c] sm:$0xff] }
 0x333   : > { %1765 = vst.msk [vmem:[#allocation2 + $0x24] sm:$0xf] %vm1763_vm3, %v3367_v6  ;;  %v1040_v62 = vpack.c.bf16 %v992_v60, %v991_v21  ;;  %v984_v5 = vld [vmem:[#allocation2 + $0x28] sm:$0xff]  ;;  %v1042_v14 = vpack.c.bf16 %v994_v8, %v993_v7  ;;  %v985_v16 = vld [vmem:[#allocation2 + $0x30] sm:$0xff]  ;;  %v986_v17 = vld [vmem:[#allocation2 + $0x38] sm:$0xff] }
 0x334   : > { %v3264_v7 = vld [vmem:[%s4264_s3 + $0xc0] sm:$0xff]   ;;  %v3265_v8 = vld [vmem:[%s4264_s3 + $0xc8] sm:$0xff]  }
 0x36e   : > { %v3204_v43 = vpop.permute.xlu1 %3203 }
 0x36f   : > { %v3199_v59 = vpop.permute.xlu0 %3198  ;;  %v3206_v50 = vunpack.i.h.bf16 %v3204_v43  ;;  %v3205_v53 = vunpack.i.l.bf16 %v3204_v43 }
 0x370   : > { %v3201_v41 = vunpack.i.h.bf16 %v3199_v59  ;;  %v3200_v42 = vunpack.i.l.bf16 %v3199_v59 }
 0x371   : > { %v1029_v57 = vsel %vm579_vm2, %v981_v55, %v3205_v53  ;;  %v1030_v51 = vsel %vm579_vm2, %v982_v56, %v3206_v50 }
 0x372   : > { %v1028_v46 = vsel %vm579_vm2, %v980_v44, %v3201_v41  ;;  %v1027_v58 = vsel %vm579_vm2, %v979_v23, %v3200_v42  ;;  %v1037_v61 = vpack.c.bf16 %v1030_v51, %v1029_v57  ;;  %v3260_v23 = vld [vmem:[%s4266_s5 + $0x20] sm:$0xff]  }
 0x373   : > { %v1035_v48 = vpack.c.bf16 %v1028_v46, %v1027_v58  ;;  %3054 = vmatprep.subr.bf16.mxu0 %v3260_v23 }
 0x374   : > { %3055 = vmatpush3.bf16.msra.mxu0 %v3260_v23 }
 0x375   : > { %1193 = vmatmul.mubr.bf16.vlgmr.msra.gmra.mrb[8].mxu1 %v1035_v48  ;;  %3056 = vmatprep.subr.bf16.mxu0 %v3261_v63 }
 0x376   : > { %2862 = vmatprep.mubr.msk.bf16.mxu1 %vm579_vm2, %v1038_v54  ;;  %1978 = vmatpush1.bf16.msra.mxu1 %v3264_v7 }
 0x377   : > { %1979 = vmatprep.subr.bf16.mxu1 %v3365_v1 }
 0x378   : > { %3057 = vmatpush3.bf16.msra.mxu0 %v3261_v63 }
 0x379   : > { %3058 = vmatprep.subr.bf16.mxu0 %v3262_v22 }
 0x37a   : > { %1980 = vmatpush1.bf16.msra.mxu1 %v3265_v8 }
 0x37b   : > { %1981 = vmatprep.subr.bf16.mxu1 %v3365_v1 }
 0x37c   : > { %3059 = vmatpush3.bf16.msra.mxu0 %v3262_v22 }
 0x37d   : > { %1201 = vmatmul.mubr.bf16.gmra.mrb[12].mxu1 %v1037_v61  ;;  %3060 = vmatprep.subr.bf16.mxu0 %v3263_v31 }
 0x37e   : > { %2863 = vmatprep.mubr.msk.bf16.mxu1 %vm579_vm2, %v1040_v62 }
 0x380   : > { %3061 = vmatpush3.bf16.msra.mxu0 %v3263_v31 }
 0x39e   : > { %v3214_v4 = vpop.permute.xlu1 %3213 }
 0x39f   : > { %v3209_v0 = vpop.permute.xlu0 %3208  ;;  %v3216_v12 = vunpack.i.h.bf16 %v3214_v4  ;;  %v3215_v13 = vunpack.i.l.bf16 %v3214_v4 }
 0x3a0   : > { %v3211_v2 = vunpack.i.h.bf16 %v3209_v0  ;;  %v3210_v3 = vunpack.i.l.bf16 %v3209_v0 }
 0x3a1   : > { %v1033_v18 = vsel %vm579_vm2, %v985_v16, %v3215_v13  ;;  %v1034_v47 = vsel %vm579_vm2, %v986_v17, %v3216_v12  ;;  %v3370_v12 = vmov 1983009808   ;;  %v3269_v16 = vld [vmem:[%s4264_s3 + $0xe8] sm:$0xff]  }
 0x3a2   : > { %v1031_v9 = vsel %vm579_vm2, %v983_v40, %v3210_v3  ;;  %v1032_v10 = vsel %vm579_vm2, %v984_v5, %v3211_v2  ;;  %v1041_v19 = vpack.c.bf16 %v1034_v47, %v1033_v18  ;;  %v1373_v13 = vunpack.c.l.s4 %v3370_v12  ;;  %v3860_v47 = vld [vmem:[%s4267_s6 + $0x1] ss:$0 sm:$0xff] }
 0x3a3   : > { %v1039_v11 = vpack.c.bf16 %v1032_v10, %v1031_v9  ;;  %v3266_v9 = vld [vmem:[%s4264_s3 + $0xd0] sm:$0xff]   ;;  %v3267_v10 = vld [vmem:[%s4264_s3 + $0xd8] sm:$0xff]  }
 0x3a4   : > { %1982 = vmatpush1.bf16.msra.mxu1 %v3266_v9  ;;  %v1374_v17 = vunpack.c.0.s8 %v1373_v13 }
 0x3a5   : > { %1209 = vmatmul.mubr.bf16.gmra.mrb[16].mxu1 %v1039_v11  ;;  %1983 = vmatprep.subr.bf16.mxu1 %v3365_v1  ;;  %v3268_v11 = vld [vmem:[%s4264_s3 + $0xe0] sm:$0xff]  }
 0x3a6   : > { %2864 = vmatprep.mubr.msk.bf16.mxu1 %vm579_vm2, %v1042_v14  ;;  %v1375_v14 = vlaneseq }
 0x3a8   : > { %1984 = vmatpush1.bf16.msra.mxu1 %v3267_v10  ;;  %v1376_v18 = vshrl.u32 %v1375_v14, 7 }
 0x3a9   : > { %1985 = vmatprep.subr.bf16.mxu1 %v3365_v1 }
 0x3aa   : > { %v3867_v22 = vsub.s32 %v1374_v17, %v1376_v18  ;;  %v3274_v18 = vld [vmem:[%s4264_s3 + $0x110] sm:$0xff]  }
 0x3ac   : > { %1986 = vmatpush1.bf16.msra.mxu1 %v3268_v11 }
 0x3ad   : > { %1217 = vmatmul.mubr.bf16.gmra.mrb[20].mxu1 %v1041_v19  ;;  %1987 = vmatprep.subr.bf16.mxu1 %v3365_v1  ;;  %v3270_v19 = vld [vmem:[%s4264_s3 + $0xf0] sm:$0xff]  }
 0x3b0   : > { %1988 = vmatpush1.bf16.msra.mxu1 %v3269_v16 }
 0x3b1   : > { %1989 = vmatprep.subr.bf16.mxu1 %v3365_v1 }
 0x3b4   : > { %1990 = vmatpush1.bf16.msra.mxu1 %v3270_v19 }
 0x3b5   : > { %1991 = vmatprep.subr.bf16.mxu1 %v3365_v1 }
 0x448   : > { %v1194_v26 = vpop.f32.mrb[8].mxu1 }
 0x449   : > { %v1195_v27 = vadd.f32 %v2848_v25, %v1194_v26  ;;  %v1196_v38 = vpop.f32.mrb[9].mxu1 }
 0x44a   : > { %v1197_v28 = vpop.f32.mrb[10].mxu1 }
 0x44b   : > { %v1198_v33 = vadd.f32 %v2848_v25, %v1197_v28  ;;  %v1199_v34 = vpop.f32.mrb[11].mxu1  ;;  %v1225_v36 = vmax.f32 %v1195_v27, 0.0 }
 0x44d   : > { %v1226_v52 = vmax.f32 %v1198_v33, 0.0  ;;  %v3271_v33 = vld [vmem:[%s4264_s3 + $0xf8] sm:$0xff]  }
 0x44e   : > { %1992 = vmatpush1.bf16.msra.mxu1 %v3271_v33 }
 0x44f   : > { %v1233_v29 = vpack.c.bf16 %v1226_v52, %v1225_v36  ;;  %1993 = vmatprep.subr.bf16.mxu1 %v3365_v1 }
 0x450   : > { %v1202_v21 = vpop.f32.mrb[12].mxu1 }
 0x451   : > { %v1203_v40 = vadd.f32 %v2848_v25, %v1202_v21  ;;  %v1204_v59 = vpop.f32.mrb[13].mxu1  ;;  %3062 = vmatprep.mubr.msk.bf16.mxu0 %vm579_vm2, %v1233_v29 }
 0x452   : > { %v1205_v41 = vpop.f32.mrb[14].mxu1 }
 0x453   : > { %v1206_v42 = vadd.f32 %v2848_v25, %v1205_v41  ;;  %v1207_v43 = vpop.f32.mrb[15].mxu1  ;;  %v1227_v44 = vmax.f32 %v1203_v40, 0.0 }
 0x455   : > { %v1228_v45 = vmax.f32 %v1206_v42, 0.0 }
 0x457   : > { %v1234_v46 = vpack.c.bf16 %v1228_v45, %v1227_v44 }
 0x459   : > { %3063 = vmatmul.mubr.msk.bf16.vlgmr.msra.gmra.mrb[16].mxu0 %vm579_vm2, %v1234_v46 }
 0x478   : > { %v1210_v58 = vpop.f32.mrb[16].mxu1 }
 0x479   : > { %v1211_v48 = vadd.f32 %v2848_v25, %v1210_v58  ;;  %v1212_v49 = vpop.f32.mrb[17].mxu1 }
 0x47a   : > { %v1213_v50 = vpop.f32.mrb[18].mxu1 }
 0x47b   : > { %v1214_v53 = vadd.f32 %v2848_v25, %v1213_v50  ;;  %v1215_v54 = vpop.f32.mrb[19].mxu1  ;;  %v1229_v55 = vmax.f32 %v1211_v48, 0.0 }
 0x47d   : > { %v1230_v56 = vmax.f32 %v1214_v53, 0.0 }
 0x47f   : > { %v1235_v57 = vpack.c.bf16 %v1230_v56, %v1229_v55 }
 0x480   : > { %v1218_v51 = vpop.f32.mrb[20].mxu1 }
 0x481   : > { %v1219_v60 = vadd.f32 %v2848_v25, %v1218_v51  ;;  %v1220_v61 = vpop.f32.mrb[21].mxu1  ;;  %3066 = vmatprep.mubr.msk.bf16.mxu0 %vm579_vm2, %v1235_v57 }
 0x482   : > { %v1221_v62 = vpop.f32.mrb[22].mxu1  ;;  %v3273_v61 = vld [vmem:[%s4264_s3 + $0x108] sm:$0xff]  }
 0x483   : > { %v1222_v0 = vadd.f32 %v2848_v25, %v1221_v62  ;;  %v1223_v2 = vpop.f32.mrb[23].mxu1  ;;  %v1231_v3 = vmax.f32 %v1219_v60, 0.0 }
 0x485   : > { %v1232_v4 = vmax.f32 %v1222_v0, 0.0 }
 0x487   : > { %v1236_v5 = vpack.c.bf16 %v1232_v4, %v1231_v3 }
 0x489   : > { %3067 = vmatmul.mubr.msk.bf16.gmra.mrb[20].mxu0 %vm579_vm2, %v1236_v5 }
 0x52c   : > { %v3064_v23 = vpop.f32.mrb[16].mxu0 }
 0x52d   : > { %v1333_v63 = vadd.f32 %v3064_v23, %v3860_v47  ;;  %v1324_v31 = vpop.f32.mrb[17].mxu0 }
 0x52e   : > { %v1325_v25 = vadd.f32 %v3860_v47, %v1324_v31  ;;  %v3065_v26 = vpop.f32.mrb[18].mxu0 }
 0x52f   : > { %v1357_v27 = vadd.f32 %v1333_v63, %v3748_v15  ;;  %v1336_v38 = vadd.f32 %v3065_v26, %v3860_v47  ;;  %v1327_v28 = vpop.f32.mrb[19].mxu0 }
 0x530   : > { %v1355_v34 = vadd.f32 %v1325_v25, %v3751_v24  ;;  %v1328_v15 = vadd.f32 %v3860_v47, %v1327_v28  ;;  %v3272_v24 = vld [vmem:[%s4264_s3 + $0x100] sm:$0xff]  }
 0x531   : > { %v1405_v36 = vcombine.high %v1357_v27, %v1357_v27  ;;  %v1412_v52 = vrot.slane %v1357_v27, %v3867_v22  ;;  %v3883_v42 = vadd.f32 %v1336_v38, %v3756_v20  ;;  %1994 = vmatpush1.bf16.msra.mxu1 %v3272_v24 }
 0x532   : > { %v1371_v29 = vcombine.high %v1355_v34, %v1355_v34  ;;  %v1378_v21 = vrot.slane %v1355_v34, %v3867_v22  ;;  %1995 = vmatprep.subr.bf16.mxu1 %v3365_v1 }
 0x533   : > { %v1419_v40 = vrot.slane %v1405_v36, %v3867_v22  ;;  %v1420_v59 = vcombine.high %v1412_v52, %v1412_v52  ;;  %v1595_v41 = vsel %vm968_vm1, %v1412_v52, -inf  ;;  %v1422_v38 = vcombine.high %v3883_v42, %v3883_v42 }
 0x534   : > { %v1596_v43 = vrot.slane %v1595_v41, 4  ;;  %v1385_v44 = vrot.slane %v1371_v29, %v3867_v22  ;;  %v1386_v45 = vcombine.high %v1378_v21, %v1378_v21  ;;  %v1539_v46 = vsel %vm968_vm1, %v1378_v21, -inf }
 0x535   : > { %v1421_v58 = vcombine.high %v1419_v40, %v1419_v40  ;;  %v1602_v48 = vsel %vm968_vm1, %v1420_v59, -inf  ;;  %v1609_v49 = vsel %vm968_vm1, %v1419_v40, -inf  ;;  %v1540_v20 = vrot.slane %v1539_v46, 4  ;;  %1996 = vmatpush1.bf16.msra.mxu1 %v3273_v61 }
 0x536   : > { %v1597_v50 = vmax.f32 %v1595_v41, %v1596_v43  ;;  %v1603_v53 = vrot.slane %v1602_v48, 4  ;;  %v1610_v54 = vrot.slane %v1609_v49, 4  ;;  %v1387_v55 = vcombine.high %v1385_v44, %v1385_v44  ;;  %1997 = vmatprep.subr.bf16.mxu1 %v3365_v1 }
 0x537   : > { %v1616_v56 = vsel %vm968_vm1, %v1421_v58, -inf  ;;  %v1541_v57 = vmax.f32 %v1539_v46, %v1540_v20  ;;  %v1546_v51 = vsel %vm968_vm1, %v1386_v45, -inf  ;;  %v1553_v60 = vsel %vm968_vm1, %v1385_v44, -inf }
 0x538   : > { %v1598_v62 = vrot.slane %v1597_v50, 2  ;;  %v1604_v0 = vmax.f32 %v1602_v48, %v1603_v53  ;;  %v1611_v2 = vmax.f32 %v1609_v49, %v1610_v54  ;;  %v1617_v3 = vrot.slane %v1616_v56, 4 }
 0x539   : > { %v1542_v4 = vrot.slane %v1541_v57, 2  ;;  %v1547_v5 = vrot.slane %v1546_v51, 4  ;;  %v1554_v7 = vrot.slane %v1553_v60, 4  ;;  %v1560_v8 = vsel %vm968_vm1, %v1387_v55, -inf  ;;  %1998 = vmatpush1.bf16.msra.mxu1 %v3274_v18 }
 0x53a   : > { %v1599_v9 = vmax.f32 %v1597_v50, %v1598_v62  ;;  %v1605_v10 = vrot.slane %v1604_v0, 2  ;;  %v1612_v11 = vrot.slane %v1611_v2, 2  ;;  %v1618_v12 = vmax.f32 %v1616_v56, %v1617_v3  ;;  %1999 = vmatprep.subr.bf16.mxu1 %v3365_v1 }
 0x53b   : > { %v1543_v13 = vmax.f32 %v1541_v57, %v1542_v4  ;;  %v1548_v14 = vmax.f32 %v1546_v51, %v1547_v5  ;;  %v1555_v16 = vmax.f32 %v1553_v60, %v1554_v7  ;;  %v1561_v17 = vrot.slane %v1560_v8, 4 }
 0x53c   : > { %v1600_v19 = vrot.slane %v1599_v9, 1  ;;  %v1606_v23 = vmax.f32 %v1604_v0, %v1605_v10  ;;  %v1613_v63 = vmax.f32 %v1611_v2, %v1612_v11  ;;  %v1619_v31 = vrot.slane %v1618_v12, 2 }
 0x53d   : > { %v1549_v25 = vrot.slane %v1548_v14, 2  ;;  %v1556_v26 = vrot.slane %v1555_v16, 2  ;;  %v1562_v27 = vmax.f32 %v1560_v8, %v1561_v17  ;;  %v1544_v36 = vrot.slane %v1543_v13, 1 }
 0x53e   : > { %v1607_v28 = vrot.slane %v1606_v23, 1  ;;  %v1614_v33 = vrot.slane %v1613_v63, 1  ;;  %v1620_v34 = vmax.f32 %v1618_v12, %v1619_v31  ;;  %v1356_v40 = vadd.f32 %v1328_v15, %v3761_v30 }
 0x53f   : > { %v1550_v52 = vmax.f32 %v1548_v14, %v1549_v25  ;;  %v1557_v29 = vmax.f32 %v1555_v16, %v1556_v26  ;;  %v1563_v21 = vrot.slane %v1562_v27, 2  ;;  %v1601_v59 = vmax.f32 %v1599_v9, %v1600_v19 }
 0x540   : > { %v1608_v41 = vmax.f32 %v1606_v23, %v1607_v28  ;;  %v1621_v24 = vrot.slane %v1620_v34, 1  ;;  %v1429_v43 = vrot.slane %v3883_v42, %v3867_v22  ;;  %v1436_v58 = vrot.slane %v1422_v38, %v3867_v22 }
 0x541   : > { %v1551_v44 = vrot.slane %v1550_v52, 1  ;;  %v1558_v45 = vrot.slane %v1557_v29, 1  ;;  %v1564_v46 = vmax.f32 %v1562_v27, %v1563_v21  ;;  %v3912_v48 = vmax.f32 %v1613_v63, %v1614_v33 }
 0x542   : > { %v1545_v49 = vmax.f32 %v1543_v13, %v1544_v36  ;;  %v1437_v20 = vcombine.high %v1429_v43, %v1429_v43  ;;  %v1623_v30 = vsel %vm968_vm1, %v1429_v43, -inf  ;;  %v3915_v15 = vmax.f32 %v1620_v34, %v1621_v24 }
 0x543   : > { %v3918_v50 = vsel %vm1798_vm4, %v1608_v41, %v1601_v59  ;;  %v1552_v53 = vmax.f32 %v1550_v52, %v1551_v44  ;;  %v1438_v42 = vcombine.high %v1436_v58, %v1436_v58  ;;  %v1624_v54 = vrot.slane %v1623_v30, 4 }
 0x544   : > { %v1630_v55 = vsel %vm968_vm1, %v1437_v20, -inf  ;;  %v1637_v56 = vsel %vm968_vm1, %v1436_v58, -inf  ;;  %v1388_v57 = vcombine.high %v1356_v40, %v1356_v40  ;;  %v1559_v51 = vmax.f32 %v1557_v29, %v1558_v45 }
 0x545   : > { %v1565_v60 = vrot.slane %v1564_v46, 1  ;;  %v1631_v61 = vrot.slane %v1630_v55, 4  ;;  %v1638_v62 = vrot.slane %v1637_v56, 4  ;;  %v1625_v0 = vmax.f32 %v1623_v30, %v1624_v54 }
 0x546   : > { %v1644_v2 = vsel %vm968_vm1, %v1438_v42, -inf  ;;  %v1395_v3 = vrot.slane %v1356_v40, %v3867_v22  ;;  %v1402_v4 = vrot.slane %v1388_v57, %v3867_v22  ;;  %v1799_v5 = vsel %vm1798_vm4, %v1552_v53, %v1545_v49 }
 0x547   : > { %v1632_v7 = vmax.f32 %v1630_v55, %v1631_v61  ;;  %v1639_v8 = vmax.f32 %v1637_v56, %v1638_v62  ;;  %v1645_v9 = vrot.slane %v1644_v2, 4  ;;  %v1626_v10 = vrot.slane %v1625_v0, 2  ;;  %v3275_v61 = vld [vmem:[%s4264_s3 + $0x118] sm:$0xff]  }
 0x548   : > { %v1403_v11 = vcombine.high %v1395_v3, %v1395_v3  ;;  %v1404_v12 = vcombine.high %v1402_v4, %v1402_v4  ;;  %v1567_v13 = vsel %vm968_vm1, %v1395_v3, -inf  ;;  %v1581_v63 = vsel %vm968_vm1, %v1402_v4, -inf  ;;  %2000 = vmatpush1.bf16.msra.mxu1 %v3275_v61 }
 0x549   : > { %v1633_v14 = vrot.slane %v1632_v7, 2  ;;  %v1640_v16 = vrot.slane %v1639_v8, 2  ;;  %v1646_v17 = vmax.f32 %v1644_v2, %v1645_v9  ;;  %v1568_v18 = vrot.slane %v1567_v13, 4  ;;  %3082 = vmatprep.subr.bf16.mxu1 %v3367_v6 }
 0x54a   : > { %v1627_v19 = vmax.f32 %v1625_v0, %v1626_v10  ;;  %v1574_v23 = vsel %vm968_vm1, %v1403_v11, -inf  ;;  %v1588_v31 = vsel %vm968_vm1, %v1404_v12, -inf  ;;  %v1582_v34 = vrot.slane %v1581_v63, 4 }
 0x54b   : > { %v1634_v25 = vmax.f32 %v1632_v7, %v1633_v14  ;;  %v1641_v26 = vmax.f32 %v1639_v8, %v1640_v16  ;;  %v1647_v27 = vrot.slane %v1646_v17, 2  ;;  %v1569_v38 = vmax.f32 %v1567_v13, %v1568_v18 }
 0x54c   : > { %v1628_v28 = vrot.slane %v1627_v19, 1  ;;  %v1575_v33 = vrot.slane %v1574_v23, 4  ;;  %v1589_v36 = vrot.slane %v1588_v31, 4  ;;  %v1566_v52 = vmax.f32 %v1564_v46, %v1565_v60 }
 0x54d   : > { %v1635_v29 = vrot.slane %v1634_v25, 1  ;;  %v1570_v21 = vrot.slane %v1569_v38, 2  ;;  %v1648_v40 = vmax.f32 %v1646_v17, %v1647_v27  ;;  %v1583_v41 = vmax.f32 %v1581_v63, %v1582_v34 }
 0x54e   : > { %v1576_v59 = vmax.f32 %v1574_v23, %v1575_v33  ;;  %v1590_v24 = vmax.f32 %v1588_v31, %v1589_v36  ;;  %v1801_v43 = vsel %vm1800_vm5, %v1559_v51, %v1799_v5  ;;  %v1642_v44 = vrot.slane %v1641_v26, 1 }
 0x54f   : > { %v1571_v45 = vmax.f32 %v1569_v38, %v1570_v21  ;;  %v1649_v58 = vrot.slane %v1648_v40, 1  ;;  %v1629_v49 = vmax.f32 %v1627_v19, %v1628_v28  ;;  %v1584_v30 = vrot.slane %v1583_v41, 2 }
 0x550   : > { %v1577_v20 = vrot.slane %v1576_v59, 2  ;;  %v1591_v53 = vrot.slane %v1590_v24, 2  ;;  %v1636_v42 = vmax.f32 %v1634_v25, %v1635_v29  ;;  %v1803_v46 = vsel %vm1802_vm6, %v1566_v52, %v1801_v43 }
 0x551   : > { %v1572_v54 = vrot.slane %v1571_v45, 1  ;;  %v1813_v55 = vsel %vm1800_vm5, %v3912_v48, %v3918_v50  ;;  %v1585_v57 = vmax.f32 %v1583_v41, %v1584_v30  ;;  %v1643_v0 = vmax.f32 %v1641_v26, %v1642_v44 }
 0x552   : > { %v1578_v56 = vmax.f32 %v1576_v59, %v1577_v20  ;;  %v1592_v60 = vmax.f32 %v1590_v24, %v1591_v53  ;;  %v1814_v51 = vsel %vm1802_vm6, %v3915_v15, %v1813_v55  ;;  %v1650_v2 = vmax.f32 %v1648_v40, %v1649_v58 }
 0x553   : > { %v1573_v62 = vmax.f32 %v1571_v45, %v1572_v54  ;;  %v1815_v3 = vsel %vm1804_vm7, %v1629_v49, %v1814_v51  ;;  %v1586_v5 = vrot.slane %v1585_v57, 1 }
 0x554   : > { %v1579_v4 = vrot.slane %v1578_v56, 1  ;;  %v1593_v7 = vrot.slane %v1592_v60, 1  ;;  %v1816_v48 = vsel %vm1806_vm8, %v1636_v42, %v1815_v3 }
 0x555   : > { %v1805_v50 = vsel %vm1804_vm7, %v1573_v62, %v1803_v46  ;;  %v1817_v8 = vsel %vm1808_vm9, %v1643_v0, %v1816_v48  ;;  %v1587_v10 = vmax.f32 %v1585_v57, %v1586_v5 }
 0x556   : > { %v1580_v15 = vmax.f32 %v1578_v56, %v1579_v4  ;;  %v3946_v9 = vsel %vm1810_vm10, %v1650_v2, %v1817_v8  ;;  %v1594_v11 = vmax.f32 %v1592_v60, %v1593_v7 }
 0x557   : > { %1838 = vst.msk [vmem:[#allocation2 + $0xc] sm:$0xff] %vm579_vm2, %v3946_v9 }
 0x558   : > { %v1807_v12 = vsel %vm1806_vm8, %v1580_v15, %v1805_v50 }
 0x559   : > { %v1809_v13 = vsel %vm1808_vm9, %v1587_v10, %v1807_v12 }
 0x55a   : > { %v3953_v14 = vsel %vm1810_vm10, %v1594_v11, %v1809_v13 }
 0x55b   : > { %v3217_v16 = vpack.i.bf16 %v3946_v9, %v3953_v14  ;;  %1837 = vst.msk [vmem:[#allocation2 + $0x4] sm:$0xff] %vm579_vm2, %v3953_v14 }
 0x55c   : > { %v3068_v17 = vpop.f32.mrb[20].mxu0 }
 0x55d   : > { %3218 = vrot.lane.b32.xlu0 %v3217_v16, %s3369_s24  ;;  %v1349_v18 = vadd.f32 %v3068_v17, %v3860_v47  ;;  %v1340_v19 = vpop.f32.mrb[21].mxu0 }
 0x55e   : > { %v1341_v23 = vadd.f32 %v3860_v47, %v1340_v19  ;;  %v3069_v63 = vpop.f32.mrb[22].mxu0 }
 0x55f   : > { %v1361_v31 = vadd.f32 %v1349_v18, %v3777_v32  ;;  %v1352_v25 = vadd.f32 %v3069_v63, %v3860_v47  ;;  %v1343_v26 = vpop.f32.mrb[23].mxu0 }
 0x560   : > { %v1359_v27 = vadd.f32 %v1341_v23, %v3780_v35  ;;  %v1344_v36 = vadd.f32 %v3860_v47, %v1343_v26 }
 0x561   : > { %v1473_v38 = vcombine.high %v1361_v31, %v1361_v31  ;;  %v1480_v28 = vrot.slane %v1361_v31, %v3867_v22  ;;  %v1362_v40 = vadd.f32 %v1352_v25, %v3785_v37 }
 0x562   : > { %v1439_v33 = vcombine.high %v1359_v27, %v1359_v27  ;;  %v1446_v34 = vrot.slane %v1359_v27, %v3867_v22  ;;  %v3968_v52 = vld [vmem:[#allocation2] sm:$0xff]  ;;  %v1360_v27 = vadd.f32 %v1344_v36, %v3790_v39 }
 0x563   : > { %v1487_v29 = vrot.slane %v1473_v38, %v3867_v22  ;;  %v1488_v21 = vcombine.high %v1480_v28, %v1480_v28  ;;  %v1707_v32 = vsel %vm968_vm1, %v1480_v28, -inf  ;;  %2332 = vst.msk [vmem:[#allocation2] sm:$0xff] %vm579_vm2, %v3367_v6  ;;  %v1490_v17 = vcombine.high %v1362_v40, %v1362_v40 }
 0x564   : > { %v1708_v35 = vrot.slane %v1707_v32, 4  ;;  %v1453_v59 = vrot.slane %v1439_v33, %v3867_v22  ;;  %v1454_v41 = vcombine.high %v1446_v34, %v1446_v34  ;;  %v1651_v24 = vsel %vm968_vm1, %v1446_v34, -inf }
 0x565   : > { %v1489_v43 = vcombine.high %v1487_v29, %v1487_v29  ;;  %v1714_v47 = vsel %vm968_vm1, %v1488_v21, -inf  ;;  %v1721_v44 = vsel %vm968_vm1, %v1487_v29, -inf  ;;  %v1652_v45 = vrot.slane %v1651_v24, 4 }
 0x566   : > { %v1709_v58 = vmax.f32 %v1707_v32, %v1708_v35  ;;  %v1715_v49 = vrot.slane %v1714_v47, 4  ;;  %v1722_v20 = vrot.slane %v1721_v44, 4  ;;  %v1455_v30 = vcombine.high %v1453_v59, %v1453_v59 }
 0x567   : > { %v1728_v37 = vsel %vm968_vm1, %v1489_v43, -inf  ;;  %v1653_v53 = vmax.f32 %v1651_v24, %v1652_v45  ;;  %v1658_v42 = vsel %vm968_vm1, %v1454_v41, -inf  ;;  %v1665_v54 = vsel %vm968_vm1, %v1453_v59, -inf }
 0x568   : > { %v1710_v46 = vrot.slane %v1709_v58, 2  ;;  %v1716_v55 = vmax.f32 %v1714_v47, %v1715_v49  ;;  %v1723_v56 = vmax.f32 %v1721_v44, %v1722_v20  ;;  %v1729_v57 = vrot.slane %v1728_v37, 4 }
 0x569   : > { %v1654_v60 = vrot.slane %v1653_v53, 2  ;;  %v1659_v51 = vrot.slane %v1658_v42, 4  ;;  %v1666_v61 = vrot.slane %v1665_v54, 4  ;;  %v1672_v62 = vsel %vm968_vm1, %v1455_v30, -inf }
 0x56a   : > { %v1711_v0 = vmax.f32 %v1709_v58, %v1710_v46  ;;  %v1717_v2 = vrot.slane %v1716_v55, 2  ;;  %v1724_v3 = vrot.slane %v1723_v56, 2  ;;  %v1730_v4 = vmax.f32 %v1728_v37, %v1729_v57 }
 0x56b   : > { %v1655_v5 = vmax.f32 %v1653_v53, %v1654_v60  ;;  %v1660_v7 = vmax.f32 %v1658_v42, %v1659_v51  ;;  %v1667_v48 = vmax.f32 %v1665_v54, %v1666_v61  ;;  %v1673_v50 = vrot.slane %v1672_v62, 4 }
 0x56c   : > { %v1712_v8 = vrot.slane %v1711_v0, 1  ;;  %v1718_v15 = vmax.f32 %v1716_v55, %v1717_v2  ;;  %v1725_v10 = vmax.f32 %v1723_v56, %v1724_v3  ;;  %v1731_v11 = vrot.slane %v1730_v4, 2 }
 0x56d   : > { %v1661_v12 = vrot.slane %v1660_v7, 2  ;;  %v1668_v13 = vrot.slane %v1667_v48, 2  ;;  %v1674_v16 = vmax.f32 %v1672_v62, %v1673_v50  ;;  %v1656_v63 = vrot.slane %v1655_v5, 1 }
 0x56e   : > { %v1719_v18 = vrot.slane %v1718_v15, 1  ;;  %v1726_v19 = vrot.slane %v1725_v10, 1  ;;  %v1732_v23 = vmax.f32 %v1730_v4, %v1731_v11  ;;  %v1713_v38 = vmax.f32 %v1711_v0, %v1712_v8 }
 0x56f   : > { %v1662_v31 = vmax.f32 %v1660_v7, %v1661_v12  ;;  %v1669_v25 = vmax.f32 %v1667_v48, %v1668_v13  ;;  %v1675_v26 = vrot.slane %v1674_v16, 2  ;;  %v1497_v34 = vrot.slane %v1362_v40, %v3867_v22 }
 0x570   : > { %v1720_v28 = vmax.f32 %v1718_v15, %v1719_v18  ;;  %v1733_v33 = vrot.slane %v1732_v23, 1  ;;  %v1504_v35 = vrot.slane %v1490_v17, %v3867_v22  ;;  %v3986_v59 = vmax.f32 %v1725_v10, %v1726_v19 }
 0x571   : > { %v1663_v29 = vrot.slane %v1662_v31, 1  ;;  %v1670_v21 = vrot.slane %v1669_v25, 1  ;;  %v1676_v32 = vmax.f32 %v1674_v16, %v1675_v26  ;;  %v1657_v41 = vmax.f32 %v1655_v5, %v1656_v63 }
 0x572   : > { %v1505_v24 = vcombine.high %v1497_v34, %v1497_v34  ;;  %v1735_v43 = vsel %vm968_vm1, %v1497_v34, -inf  ;;  %v3989_v47 = vmax.f32 %v1732_v23, %v1733_v33  ;;  %v1826_v39 = vsel %vm1798_vm4, %v1720_v28, %v1713_v38 }
 0x573   : > { %v1664_v36 = vmax.f32 %v1662_v31, %v1663_v29  ;;  %v1506_v44 = vcombine.high %v1504_v35, %v1504_v35  ;;  %v1736_v45 = vrot.slane %v1735_v43, 4  ;;  %v1749_v58 = vsel %vm968_vm1, %v1504_v35, -inf }
 0x574   : > { %v1742_v40 = vsel %vm968_vm1, %v1505_v24, -inf  ;;  %v1456_v49 = vcombine.high %v1360_v27, %v1360_v27  ;;  %v1671_v20 = vmax.f32 %v1669_v25, %v1670_v21  ;;  %v1677_v30 = vrot.slane %v1676_v32, 1 }
 0x575   : > { %v1743_v37 = vrot.slane %v1742_v40, 4  ;;  %v1750_v53 = vrot.slane %v1749_v58, 4  ;;  %v1737_v42 = vmax.f32 %v1735_v43, %v1736_v45  ;;  %v1756_v54 = vsel %vm968_vm1, %v1506_v44, -inf }
 0x576   : > { %v1463_v46 = vrot.slane %v1360_v27, %v3867_v22  ;;  %v1470_v55 = vrot.slane %v1456_v49, %v3867_v22  ;;  %v1819_v56 = vsel %vm1798_vm4, %v1664_v36, %v1657_v41  ;;  %v1757_v51 = vrot.slane %v1756_v54, 4 }
 0x577   : > { %v1744_v57 = vmax.f32 %v1742_v40, %v1743_v37  ;;  %v1751_v60 = vmax.f32 %v1749_v58, %v1750_v53  ;;  %v1738_v61 = vrot.slane %v1737_v42, 2  ;;  %v1678_v23 = vmax.f32 %v1676_v32, %v1677_v30 }
 0x578   : > { %v1471_v62 = vcombine.high %v1463_v46, %v1463_v46  ;;  %v1472_v0 = vcombine.high %v1470_v55, %v1470_v55  ;;  %v1679_v2 = vsel %vm968_vm1, %v1463_v46, -inf  ;;  %v1758_v5 = vmax.f32 %v1756_v54, %v1757_v51 }
 0x579   : > { %v1745_v3 = vrot.slane %v1744_v57, 2  ;;  %v1752_v4 = vrot.slane %v1751_v60, 2  ;;  %v1680_v7 = vrot.slane %v1679_v2, 4  ;;  %v1739_v48 = vmax.f32 %v1737_v42, %v1738_v61 }
 0x57a   : > { %v1686_v50 = vsel %vm968_vm1, %v1471_v62, -inf  ;;  %v1693_v8 = vsel %vm968_vm1, %v1470_v55, -inf  ;;  %v1700_v15 = vsel %vm968_vm1, %v1472_v0, -inf  ;;  %v1759_v12 = vrot.slane %v1758_v5, 2 }
 0x57b   : > { %v1746_v10 = vmax.f32 %v1744_v57, %v1745_v3  ;;  %v1753_v11 = vmax.f32 %v1751_v60, %v1752_v4  ;;  %v1681_v13 = vmax.f32 %v1679_v2, %v1680_v7  ;;  %v1740_v16 = vrot.slane %v1739_v48, 1  ;;  %v1842_v2 = vld [vmem:[#allocation2 + $0x8] sm:$0xff] }
 0x57c   : > { %v1687_v17 = vrot.slane %v1686_v50, 4  ;;  %v1694_v18 = vrot.slane %v1693_v8, 4  ;;  %v1701_v19 = vrot.slane %v1700_v15, 4  ;;  %v1760_v25 = vmax.f32 %v1758_v5, %v1759_v12 }
 0x57d   : > { %v1747_v63 = vrot.slane %v1746_v10, 1  ;;  %v1682_v31 = vrot.slane %v1681_v13, 2  ;;  %v1820_v28 = vsel %vm1800_vm5, %v1671_v20, %v1819_v56  ;;  %v1754_v33 = vrot.slane %v1753_v11, 1 }
 0x57e   : > { %v1688_v26 = vmax.f32 %v1686_v50, %v1687_v17  ;;  %v1695_v27 = vmax.f32 %v1693_v8, %v1694_v18  ;;  %v1702_v38 = vmax.f32 %v1700_v15, %v1701_v19  ;;  %v1761_v29 = vrot.slane %v1760_v25, 1 }
 0x57f   : > { %v1683_v34 = vmax.f32 %v1681_v13, %v1682_v31  ;;  %v1741_v21 = vmax.f32 %v1739_v48, %v1740_v16  ;;  %v1748_v43 = vmax.f32 %v1746_v10, %v1747_v63  ;;  %v1821_v44 = vsel %vm1802_vm6, %v1678_v23, %v1820_v28  ;;  %v3277_v63 = vld [vmem:[%s4266_s5 + $0x48] sm:$0xff]   ;;  %v3278_v31 = vld [vmem:[%s4266_s5 + $0x50] sm:$0xff]  }
 0x580   : > { %v1689_v35 = vrot.slane %v1688_v26, 2  ;;  %v1696_v41 = vrot.slane %v1695_v27, 2  ;;  %v1703_v24 = vrot.slane %v1702_v38, 2  ;;  %v1827_v32 = vsel %vm1800_vm5, %v3986_v59, %v1826_v39 }
 0x581   : > { %v1684_v36 = vrot.slane %v1683_v34, 1  ;;  %v1828_v49 = vsel %vm1802_vm6, %v3989_v47, %v1827_v32  ;;  %v1755_v30 = vmax.f32 %v1753_v11, %v1754_v33  ;;  %v1762_v37 = vmax.f32 %v1760_v25, %v1761_v29  ;;  %v3279_v25 = vld [vmem:[%s4266_s5 + $0x58] sm:$0xff]  }
 0x582   : > { %v1690_v45 = vmax.f32 %v1688_v26, %v1689_v35  ;;  %v1697_v40 = vmax.f32 %v1695_v27, %v1696_v41  ;;  %v1704_v58 = vmax.f32 %v1702_v38, %v1703_v24  ;;  %v1829_v53 = vsel %vm1804_vm7, %v1741_v21, %v1828_v49  ;;  %v2908_v26 = vld [vmem:[%s4265_s4 + $0x2] ss:$0 sm:$0xff] }
 0x583   : > { %v1685_v20 = vmax.f32 %v1683_v34, %v1684_v36  ;;  %v1830_v55 = vsel %vm1806_vm8, %v1748_v43, %v1829_v53  ;;  %v3283_v53 = vld [vmem:[%s4264_s3 + $0x138] sm:$0xff]  }
 0x584   : > { %v1691_v42 = vrot.slane %v1690_v45, 1  ;;  %v1698_v54 = vrot.slane %v1697_v40, 1  ;;  %v1705_v46 = vrot.slane %v1704_v58, 1  ;;  %v1831_v59 = vsel %vm1808_vm9, %v1755_v30, %v1830_v55  ;;  %v3281_v30 = vld [vmem:[%s4264_s3 + $0x128] sm:$0xff]   ;;  %v3287_v55 = vld [vmem:[%s4264_s3 + $0x158] sm:$0xff]  }
 0x585   : > { %v1822_v56 = vsel %vm1804_vm7, %v1685_v20, %v1821_v44  ;;  %v4013_v57 = vsel %vm1810_vm10, %v1762_v37, %v1831_v59  ;;  %v3280_v20 = vld [vmem:[%s4264_s3 + $0x120] sm:$0xff]   ;;  %v3282_v37 = vld [vmem:[%s4264_s3 + $0x130] sm:$0xff]   ;;  %v3289_v59 = vld [vmem:[%s4264_s3 + $0x168] sm:$0xff]  }
 0x586   : > { %v1692_v39 = vmax.f32 %v1690_v45, %v1691_v42  ;;  %v1699_v60 = vmax.f32 %v1697_v40, %v1698_v54  ;;  %1840 = vst.msk [vmem:[#allocation2 + $0x1c] sm:$0xff] %vm579_vm2, %v4013_v57  ;;  %v1706_v47 = vmax.f32 %v1704_v58, %v1705_v46  ;;  %v3284_v42 = vld [vmem:[%s4264_s3 + $0x140] sm:$0xff]   ;;  %v3285_v54 = vld [vmem:[%s4264_s3 + $0x148] sm:$0xff]   ;;  %v3286_v46 = vld [vmem:[%s4264_s3 + $0x150] sm:$0xff]  }
 0x588   : > { %v1823_v51 = vsel %vm1806_vm8, %v1692_v39, %v1822_v56  ;;  %v3288_v56 = vld [vmem:[%s4264_s3 + $0x160] sm:$0xff]   ;;  %v3290_v39 = vld [vmem:[%s4264_s3 + $0x170] sm:$0xff]  }
 0x589   : > { %v1824_v61 = vsel %vm1808_vm9, %v1699_v60, %v1823_v51  ;;  %v2932_v60 = vld [vmem:[%s4267_s6 + $0x2] ss:$0 sm:$0xff] }
 0x58a   : > { %v4020_v62 = vsel %vm1810_vm10, %v1706_v47, %v1824_v61 }
 0x58b   : > { %v3222_v0 = vpack.i.bf16 %v4013_v57, %v4020_v62  ;;  %1839 = vst.msk [vmem:[#allocation2 + $0x14] sm:$0xff] %vm579_vm2, %v4020_v62 }
 0x58d   : > { %3223 = vrot.lane.b32.xlu1 %v3222_v0, %s3369_s24  ;;  %v1845_v8 = vld [vmem:[#allocation2 + $0x20] sm:$0xff] }
 0x592   : > { %v1843_v3 = vld [vmem:[#allocation2 + $0x10] sm:$0xff]  ;;  %v1844_v4 = vld [vmem:[#allocation2 + $0x18] sm:$0xff] }
 0x593   : > { %v1863_v5 = vpack.c.bf16 %v1843_v3, %v1842_v2  ;;  %2333 = vst.msk [vmem:[#allocation2 + $0x18] sm:$0xff] %vm579_vm2, %v3367_v6  ;;  %v1865_v12 = vpack.c.bf16 %v1845_v8, %v1844_v4 }
 0x595   : > { %2921 = vmatprep.mubr.msk.bf16.mxu1 %vm579_vm2, %v1863_v5 }
 0x5cf   : > { %v3219_v7 = vpop.permute.xlu0 %3218 }
 0x5d0   : > { %v3221_v48 = vunpack.i.h.bf16 %v3219_v7  ;;  %v3220_v50 = vunpack.i.l.bf16 %v3219_v7 }
 0x5d2   : > { %v1858_v15 = vsel %vm579_vm2, %v3968_v52, %v3220_v50  ;;  %v1859_v10 = vsel %vm579_vm2, %v1842_v2, %v3221_v48  ;;  %v3276_v52 = vld [vmem:[%s4266_s5 + $0x40] sm:$0xff]  }
 0x5d3   : > { %v1862_v11 = vpack.c.bf16 %v1859_v10, %v1858_v15  ;;  %3070 = vmatprep.subr.bf16.mxu0 %v3276_v52 }
 0x5d4   : > { %3071 = vmatpush3.bf16.msra.mxu0 %v3276_v52 }
 0x5d5   : > { %2010 = vmatmul.mubr.bf16.vlgmr.msra.gmra.mrb[24].mxu1 %v1862_v11  ;;  %3072 = vmatprep.subr.bf16.mxu0 %v3277_v63 }
 0x5d6   : > { %2922 = vmatprep.mubr.msk.bf16.mxu1 %vm579_vm2, %v1865_v12 }
 0x5d8   : > { %3073 = vmatpush3.bf16.msra.mxu0 %v3277_v63 }
 0x5d9   : > { %3074 = vmatprep.subr.bf16.mxu0 %v3278_v31 }
 0x5dc   : > { %3075 = vmatpush3.bf16.msra.mxu0 %v3278_v31 }
 0x5dd   : > { %3076 = vmatprep.subr.bf16.mxu0 %v3279_v25 }
 0x5e0   : > { %3077 = vmatpush3.bf16.msra.mxu0 %v3279_v25 }
 0x5e1   : > { %2490 = vmatprep.subr.bf16.mxu0 %v3365_v1 }
 0x5ff   : > { %v3224_v13 = vpop.permute.xlu1 %3223 }
 0x600   : > { %v3226_v16 = vunpack.i.h.bf16 %v3224_v13  ;;  %v3225_v17 = vunpack.i.l.bf16 %v3224_v13 }
 0x602   : > { %v1860_v18 = vsel %vm579_vm2, %v1843_v3, %v3225_v17  ;;  %v1861_v19 = vsel %vm579_vm2, %v1844_v4, %v3226_v16 }
 0x603   : > { %v1864_v23 = vpack.c.bf16 %v1861_v19, %v1860_v18 }
 0x605   : > { %2018 = vmatmul.mubr.bf16.gmra.mrb[28].mxu1 %v1864_v23 }
 0x606   : > { %3090 = vmatprep.mubr.msk.bf16.mxu1 %vm3371_vm11, %v3367_v6 }
 0x6a8   : > { %v2011_v27 = vpop.f32.mrb[24].mxu1 }
 0x6a9   : > { %v2012_v38 = vadd.f32 %v2908_v26, %v2011_v27  ;;  %v2013_v28 = vpop.f32.mrb[25].mxu1 }
 0x6aa   : > { %v2014_v33 = vpop.f32.mrb[26].mxu1 }
 0x6ab   : > { %v2015_v34 = vadd.f32 %v2908_v26, %v2014_v33  ;;  %v2016_v29 = vpop.f32.mrb[27].mxu1  ;;  %v2026_v21 = vmax.f32 %v2012_v38, 0.0 }
 0x6ad   : > { %v2027_v35 = vmax.f32 %v2015_v34, 0.0 }
 0x6af   : > { %v2030_v41 = vpack.c.bf16 %v2027_v35, %v2026_v21 }
 0x6b1   : > { %3078 = vmatprep.mubr.msk.bf16.mxu0 %vm579_vm2, %v2030_v41 }
 0x6d8   : > { %v2019_v24 = vpop.f32.mrb[28].mxu1 }
 0x6d9   : > { %v2020_v43 = vadd.f32 %v2908_v26, %v2019_v24  ;;  %v2021_v36 = vpop.f32.mrb[29].mxu1 }
 0x6da   : > { %v2022_v44 = vpop.f32.mrb[30].mxu1 }
 0x6db   : > { %v2023_v32 = vadd.f32 %v2908_v26, %v2022_v44  ;;  %v2024_v45 = vpop.f32.mrb[31].mxu1  ;;  %v2028_v40 = vmax.f32 %v2020_v43, 0.0 }
 0x6dd   : > { %v2029_v58 = vmax.f32 %v2023_v32, 0.0 }
 0x6df   : > { %v2031_v49 = vpack.c.bf16 %v2029_v58, %v2028_v40 }
 0x6e1   : > { %3079 = vmatmul.mubr.msk.bf16.vlgmr.msra.gmra.mrb[24].mxu0 %vm579_vm2, %v2031_v49 }
 0x6e2   : > { %2491 = vmatpush1.bf16.msra.mxu0 %v3280_v20 }
 0x6e3   : > { %2492 = vmatprep.subr.bf16.mxu0 %v3365_v1 }
 0x6e6   : > { %2493 = vmatpush1.bf16.msra.mxu0 %v3281_v30 }
 0x6e7   : > { %2494 = vmatprep.subr.bf16.mxu0 %v3365_v1 }
 0x6ea   : > { %2495 = vmatpush1.bf16.msra.mxu0 %v3282_v37 }
 0x6eb   : > { %2496 = vmatprep.subr.bf16.mxu0 %v3365_v1 }
 0x6ee   : > { %2497 = vmatpush1.bf16.msra.mxu0 %v3283_v53 }
 0x6ef   : > { %2498 = vmatprep.subr.bf16.mxu0 %v3365_v1 }
 0x6f2   : > { %2499 = vmatpush1.bf16.msra.mxu0 %v3284_v42 }
 0x6f3   : > { %2500 = vmatprep.subr.bf16.mxu0 %v3365_v1 }
 0x6f6   : > { %2501 = vmatpush1.bf16.msra.mxu0 %v3285_v54 }
 0x6f7   : > { %2502 = vmatprep.subr.bf16.mxu0 %v3365_v1 }
 0x6fa   : > { %2503 = vmatpush1.bf16.msra.mxu0 %v3286_v46 }
 0x6fb   : > { %2504 = vmatprep.subr.bf16.mxu0 %v3365_v1 }
 0x6fe   : > { %2505 = vmatpush1.bf16.msra.mxu0 %v3287_v55 }
 0x6ff   : > { %2506 = vmatprep.subr.bf16.mxu0 %v3365_v1 }
 0x702   : > { %2507 = vmatpush1.bf16.msra.mxu0 %v3288_v56 }
 0x703   : > { %2508 = vmatprep.subr.bf16.mxu0 %v3365_v1 }
 0x706   : > { %2509 = vmatpush1.bf16.msra.mxu0 %v3289_v59 }
 0x707   : > { %2510 = vmatprep.subr.bf16.mxu0 %v3365_v1 }
 0x70a   : > { %2511 = vmatpush1.bf16.msra.mxu0 %v3290_v39 }
 0x70b   : > { %2512 = vmatprep.subr.bf16.mxu0 %v3365_v1 }
 0x7b4   : > { %v3080_v47 = vpop.f32.mrb[24].mxu0 }
 0x7b5   : > { %v2122_v51 = vadd.f32 %v3080_v47, %v2932_v60  ;;  %v2113_v61 = vpop.f32.mrb[25].mxu0 }
 0x7b6   : > { %v2114_v0 = vadd.f32 %v2932_v60, %v2113_v61  ;;  %v3081_v2 = vpop.f32.mrb[26].mxu0 }
 0x7b7   : > { %v2130_v3 = vadd.f32 %v2122_v51, %v4020_v62  ;;  %v2125_v4 = vadd.f32 %v3081_v2, %v2932_v60  ;;  %v2116_v5 = vpop.f32.mrb[27].mxu0 }
 0x7b8   : > { %v2128_v7 = vadd.f32 %v2114_v0, %v3953_v14  ;;  %v2117_v15 = vadd.f32 %v2932_v60, %v2116_v5 }
 0x7b9   : > { %v2170_v48 = vcombine.high %v2130_v3, %v2130_v3  ;;  %v2177_v50 = vrot.slane %v2130_v3, %v3867_v22  ;;  %v2131_v13 = vadd.f32 %v2125_v4, %v4013_v57 }
 0x7ba   : > { %v2136_v8 = vcombine.high %v2128_v7, %v2128_v7  ;;  %v2143_v1 = vrot.slane %v2128_v7, %v3867_v22  ;;  %v2129_v2 = vadd.f32 %v2117_v15, %v3946_v9 }
 0x7bb   : > { %v2184_v10 = vrot.slane %v2170_v48, %v3867_v22  ;;  %v2185_v11 = vcombine.high %v2177_v50, %v2177_v50  ;;  %v2276_v12 = vsel %vm968_vm1, %v2177_v50, -inf  ;;  %v2187_v56 = vcombine.high %v2131_v13, %v2131_v13 }
 0x7bc   : > { %v2277_v16 = vrot.slane %v2276_v12, 4  ;;  %v2150_v62 = vrot.slane %v2136_v8, %v3867_v22  ;;  %v2151_v17 = vcombine.high %v2143_v1, %v2143_v1  ;;  %v2220_v14 = vsel %vm968_vm1, %v2143_v1, -inf }
 0x7bd   : > { %v2186_v18 = vcombine.high %v2184_v10, %v2184_v10  ;;  %v2283_v19 = vsel %vm968_vm1, %v2185_v11, -inf  ;;  %v2290_v23 = vsel %vm968_vm1, %v2184_v10, -inf  ;;  %v2221_v52 = vrot.slane %v2220_v14, 4 }
 0x7be   : > { %v2278_v63 = vmax.f32 %v2276_v12, %v2277_v16  ;;  %v2284_v31 = vrot.slane %v2283_v19, 4  ;;  %v2291_v25 = vrot.slane %v2290_v23, 4  ;;  %v2152_v26 = vcombine.high %v2150_v62, %v2150_v62 }
 0x7bf   : > { %v2297_v27 = vsel %vm968_vm1, %v2186_v18, -inf  ;;  %v2222_v38 = vmax.f32 %v2220_v14, %v2221_v52  ;;  %v2227_v57 = vsel %vm968_vm1, %v2151_v17, -inf  ;;  %v2234_v28 = vsel %vm968_vm1, %v2150_v62, -inf }
 0x7c0   : > { %v2279_v33 = vrot.slane %v2278_v63, 2  ;;  %v2285_v34 = vmax.f32 %v2283_v19, %v2284_v31  ;;  %v2292_v29 = vmax.f32 %v2290_v23, %v2291_v25  ;;  %v2298_v21 = vrot.slane %v2297_v27, 4 }
 0x7c1   : > { %v2223_v35 = vrot.slane %v2222_v38, 2  ;;  %v2228_v41 = vrot.slane %v2227_v57, 4  ;;  %v2235_v24 = vrot.slane %v2234_v28, 4  ;;  %v2241_v43 = vsel %vm968_vm1, %v2152_v26, -inf }
 0x7c2   : > { %v2280_v36 = vmax.f32 %v2278_v63, %v2279_v33  ;;  %v2286_v44 = vrot.slane %v2285_v34, 2  ;;  %v2293_v32 = vrot.slane %v2292_v29, 2  ;;  %v2299_v45 = vmax.f32 %v2297_v27, %v2298_v21 }
 0x7c3   : > { %v2224_v40 = vmax.f32 %v2222_v38, %v2223_v35  ;;  %v2229_v58 = vmax.f32 %v2227_v57, %v2228_v41  ;;  %v2236_v49 = vmax.f32 %v2234_v28, %v2235_v24  ;;  %v2242_v20 = vrot.slane %v2241_v43, 4 }
 0x7c4   : > { %v2281_v30 = vrot.slane %v2280_v36, 1  ;;  %v2287_v37 = vmax.f32 %v2285_v34, %v2286_v44  ;;  %v2294_v53 = vmax.f32 %v2292_v29, %v2293_v32  ;;  %v2300_v42 = vrot.slane %v2299_v45, 2 }
 0x7c5   : > { %v2230_v54 = vrot.slane %v2229_v58, 2  ;;  %v2237_v46 = vrot.slane %v2236_v49, 2  ;;  %v2243_v55 = vmax.f32 %v2241_v43, %v2242_v20  ;;  %v2225_v47 = vrot.slane %v2224_v40, 1 }
 0x7c6   : > { %v2288_v59 = vrot.slane %v2287_v37, 1  ;;  %v2295_v39 = vrot.slane %v2294_v53, 1  ;;  %v2301_v60 = vmax.f32 %v2299_v45, %v2300_v42  ;;  %v2282_v3 = vmax.f32 %v2280_v36, %v2281_v30 }
 0x7c7   : > { %v2231_v51 = vmax.f32 %v2229_v58, %v2230_v54  ;;  %v2238_v61 = vmax.f32 %v2236_v49, %v2237_v46  ;;  %v2244_v0 = vrot.slane %v2243_v55, 2  ;;  %v2194_v7 = vrot.slane %v2131_v13, %v3867_v22 }
 0x7c8   : > { %v2289_v4 = vmax.f32 %v2287_v37, %v2288_v59  ;;  %v2302_v5 = vrot.slane %v2301_v60, 1  ;;  %v2201_v1 = vrot.slane %v2187_v56, %v3867_v22  ;;  %v4119_v10 = vmax.f32 %v2294_v53, %v2295_v39 }
 0x7c9   : > { %v2232_v48 = vrot.slane %v2231_v51, 1  ;;  %v2239_v50 = vrot.slane %v2238_v61, 1  ;;  %v2245_v8 = vmax.f32 %v2243_v55, %v2244_v0  ;;  %v2226_v11 = vmax.f32 %v2224_v40, %v2225_v47 }
 0x7ca   : > { %v2202_v12 = vcombine.high %v2194_v7, %v2194_v7  ;;  %v2304_v16 = vsel %vm968_vm1, %v2194_v7, -inf  ;;  %v4122_v62 = vmax.f32 %v2301_v60, %v2302_v5  ;;  %v2357_v9 = vsel %vm1798_vm4, %v2289_v4, %v2282_v3 }
 0x7cb   : > { %v2233_v15 = vmax.f32 %v2231_v51, %v2232_v48  ;;  %v2203_v17 = vcombine.high %v2201_v1, %v2201_v1  ;;  %v2305_v14 = vrot.slane %v2304_v16, 4  ;;  %v2318_v18 = vsel %vm968_vm1, %v2201_v1, -inf }
 0x7cc   : > { %v2311_v13 = vsel %vm968_vm1, %v2202_v12, -inf  ;;  %v2153_v19 = vcombine.high %v2129_v2, %v2129_v2  ;;  %v2240_v23 = vmax.f32 %v2238_v61, %v2239_v50  ;;  %v2246_v52 = vrot.slane %v2245_v8, 1 }
 0x7cd   : > { %v2312_v63 = vrot.slane %v2311_v13, 4  ;;  %v2319_v31 = vrot.slane %v2318_v18, 4  ;;  %v2306_v25 = vmax.f32 %v2304_v16, %v2305_v14  ;;  %v2325_v26 = vsel %vm968_vm1, %v2203_v17, -inf  ;;  %v3291_v17 = vld [vmem:[%s4264_s3 + $0x178] sm:$0xff]  }
 0x7ce   : > { %v2160_v27 = vrot.slane %v2129_v2, %v3867_v22  ;;  %v2167_v38 = vrot.slane %v2153_v19, %v3867_v22  ;;  %v2350_v57 = vsel %vm1798_vm4, %v2233_v15, %v2226_v11  ;;  %v2326_v34 = vrot.slane %v2325_v26, 4  ;;  %2513 = vmatpush1.bf16.msra.mxu0 %v3291_v17 }
 0x7cf   : > { %v2313_v28 = vmax.f32 %v2311_v13, %v2312_v63  ;;  %v2320_v33 = vmax.f32 %v2318_v18, %v2319_v31  ;;  %v2307_v29 = vrot.slane %v2306_v25, 2  ;;  %v2247_v46 = vmax.f32 %v2245_v8, %v2246_v52 }
 0x7d0   : > { %v2168_v21 = vcombine.high %v2160_v27, %v2160_v27  ;;  %v2169_v35 = vcombine.high %v2167_v38, %v2167_v38  ;;  %v2248_v41 = vsel %vm968_vm1, %v2160_v27, -inf  ;;  %v2327_v36 = vmax.f32 %v2325_v26, %v2326_v34 }
 0x7d1   : > { %v2314_v24 = vrot.slane %v2313_v28, 2  ;;  %v2321_v43 = vrot.slane %v2320_v33, 2  ;;  %v2249_v44 = vrot.slane %v2248_v41, 4  ;;  %v2308_v32 = vmax.f32 %v2306_v25, %v2307_v29 }
 0x7d2   : > { %v2255_v45 = vsel %vm968_vm1, %v2168_v21, -inf  ;;  %v2262_v40 = vsel %vm968_vm1, %v2167_v38, -inf  ;;  %v2269_v22 = vsel %vm968_vm1, %v2169_v35, -inf  ;;  %v2328_v20 = vrot.slane %v2327_v36, 2  ;;  %v3293_v38 = vld [vmem:[%s4266_s5 + $0x68] sm:$0xff]   ;;  %v2371_v21 = vld [vmem:[#allocation2 + $0x18] sm:$0xff] }
 0x7d3   : > { %v2315_v58 = vmax.f32 %v2313_v28, %v2314_v24  ;;  %v2322_v49 = vmax.f32 %v2320_v33, %v2321_v43  ;;  %v2250_v30 = vmax.f32 %v2248_v41, %v2249_v44  ;;  %v2309_v37 = vrot.slane %v2308_v32, 1  ;;  %v2368_v24 = vld [vmem:[#allocation2] sm:$0xff] }
 0x7d4   : > { %v2256_v53 = vrot.slane %v2255_v45, 4  ;;  %v2263_v42 = vrot.slane %v2262_v40, 4  ;;  %v2270_v54 = vrot.slane %v2269_v22, 4  ;;  %v2329_v59 = vmax.f32 %v2327_v36, %v2328_v20  ;;  %v2964_v20 = vld [vmem:[%s4265_s4 + $0x3] ss:$0 sm:$0xff] }
 0x7d5   : > { %v2316_v55 = vrot.slane %v2315_v58, 1  ;;  %v2251_v56 = vrot.slane %v2250_v30, 2  ;;  %v2351_v51 = vsel %vm1800_vm5, %v2240_v23, %v2350_v57  ;;  %v2323_v61 = vrot.slane %v2322_v49, 1 }
 0x7d6   : > { %v2257_v39 = vmax.f32 %v2255_v45, %v2256_v53  ;;  %v2264_v60 = vmax.f32 %v2262_v40, %v2263_v42  ;;  %v2271_v47 = vmax.f32 %v2269_v22, %v2270_v54  ;;  %v2330_v2 = vrot.slane %v2329_v59, 1 }
 0x7d7   : > { %v2252_v0 = vmax.f32 %v2250_v30, %v2251_v56  ;;  %v2310_v3 = vmax.f32 %v2308_v32, %v2309_v37  ;;  %v2317_v48 = vmax.f32 %v2315_v58, %v2316_v55  ;;  %v2352_v1 = vsel %vm1802_vm6, %v2247_v46, %v2351_v51  ;;  %v3294_v58 = vld [vmem:[%s4266_s5 + $0x70] sm:$0xff]   ;;  %v3299_v51 = vld [vmem:[%s4268_s7 + $0x18] sm:$0xff]  }
 0x7d8   : > { %v2258_v4 = vrot.slane %v2257_v39, 2  ;;  %v2265_v5 = vrot.slane %v2264_v60, 2  ;;  %v2272_v7 = vrot.slane %v2271_v47, 2  ;;  %v2358_v8 = vsel %vm1800_vm5, %v4119_v10, %v2357_v9 }
 0x7d9   : > { %v2253_v50 = vrot.slane %v2252_v0, 1  ;;  %v2359_v15 = vsel %vm1802_vm6, %v4122_v62, %v2358_v8  ;;  %v2324_v13 = vmax.f32 %v2322_v49, %v2323_v61  ;;  %v2331_v18 = vmax.f32 %v2329_v59, %v2330_v2  ;;  %v3292_v62 = vld [vmem:[%s4266_s5 + $0x60] sm:$0xff]   ;;  %v3295_v49 = vld [vmem:[%s4266_s5 + $0x78] sm:$0xff]  }
 0x7da   : > { %v2259_v11 = vmax.f32 %v2257_v39, %v2258_v4  ;;  %v2266_v12 = vmax.f32 %v2264_v60, %v2265_v5  ;;  %v2273_v16 = vmax.f32 %v2271_v47, %v2272_v7  ;;  %v2360_v19 = vsel %vm1804_vm7, %v2310_v3, %v2359_v15  ;;  %3083 = vmatpush3.bf16.msra.mxu1 %v3292_v62  ;;  %v3296_v59 = vld [vmem:[%s4268_s7] sm:$0xff]   ;;  %v3297_v60 = vld [vmem:[%s4268_s7 + $0x8] sm:$0xff]   ;;  %v3298_v47 = vld [vmem:[%s4268_s7 + $0x10] sm:$0xff]  }
 0x7db   : > { %v2254_v14 = vmax.f32 %v2252_v0, %v2253_v50  ;;  %v2361_v10 = vsel %vm1806_vm8, %v2317_v48, %v2360_v19  ;;  %3084 = vmatprep.subr.bf16.mxu1 %v3367_v6  ;;  %v2987_v61 = vld [vmem:[%s4267_s6 + $0x3] ss:$0 sm:$0xff] }
 0x7dc   : > { %v2260_v23 = vrot.slane %v2259_v11, 1  ;;  %v2267_v52 = vrot.slane %v2266_v12, 1  ;;  %v2274_v63 = vrot.slane %v2273_v16, 1  ;;  %v2362_v31 = vsel %vm1808_vm9, %v2324_v13, %v2361_v10 }
 0x7dd   : > { %v2353_v9 = vsel %vm1804_vm7, %v2254_v14, %v2352_v1  ;;  %v4152_v26 = vsel %vm1810_vm10, %v2331_v18, %v2362_v31 }
 0x7de   : > { %v2261_v25 = vmax.f32 %v2259_v11, %v2260_v23  ;;  %v2268_v27 = vmax.f32 %v2266_v12, %v2267_v52  ;;  %2367 = vst.msk [vmem:[#allocation2 + $0x10] sm:$0xff] %vm579_vm2, %v4152_v26  ;;  %v2275_v57 = vmax.f32 %v2273_v16, %v2274_v63  ;;  %3085 = vmatpush3.bf16.msra.mxu1 %v3293_v38  ;;  %v2993_v11 = vld [vmem:[%s4269_s8] ss:$0 sm:$0xff] }
 0x7df   : > { %3086 = vmatprep.subr.bf16.mxu1 %v3367_v6 }
 0x7e0   : > { %v2354_v28 = vsel %vm1806_vm8, %v2261_v25, %v2353_v9 }
 0x7e1   : > { %v2355_v33 = vsel %vm1808_vm9, %v2268_v27, %v2354_v28 }
 0x7e2   : > { %v2356_v34 = vsel %vm1810_vm10, %v2275_v57, %v2355_v33  ;;  %3087 = vmatpush3.bf16.msra.mxu1 %v3294_v58 }
 0x7e3   : > { %v3227_v29 = vpack.i.bf16 %v4152_v26, %v2356_v34  ;;  %2366 = vst.msk [vmem:[#allocation2 + $0x8] sm:$0xff] %vm579_vm2, %v2356_v34  ;;  %3088 = vmatprep.subr.bf16.mxu1 %v3367_v6 }
 0x7e5   : > { %3228 = vrot.lane.b32.xlu0 %v3227_v29, %s3369_s24  ;;  %v2370_v35 = vld [vmem:[#allocation2 + $0x10] sm:$0xff]  ;;  %s3300_s24 = scalar_lea.vmem %s4211_s23, 256 }
 0x7e6   : > { %v2381_v41 = vpack.c.bf16 %v2371_v21, %v2370_v35  ;;  %3089 = vmatpush3.bf16.msra.mxu1 %v3295_v49  ;;  %p3301_p11 = scmp.ne.s32.totalorder %s4211_s23, %s3300_s24  ;;  %p3308_p1 = scmp.lt.s32.totalorder %s3306_s17, %s3300_s24 }
 0x7e7   : > { %3094 = vmatprep.subr.bf16.mxu1 %v3367_v6 }
 0x7e8   : > { %2977 = vmatprep.mubr.msk.bf16.mxu0 %vm579_vm2, %v2381_v41  ;;  %p3302_p12 = pnand %p3301_p11, %p3463_p5  ;;  %p3309_p2 = por %p3308_p1, %p3307_p0 }
 0x7ea   : > { %v2369_v32 = vld [vmem:[#allocation2 + $0x8] sm:$0xff]  ;;  %p3303_p13 = pneg %p3302_p12 }
 0x7ec   : > { %p3310_p3 = pnand %p3309_p2, %p3303_p13 }
 0x857   : > { %v3229_v43 = vpop.permute.xlu0 %3228 }
 0x858   : > { %v3231_v36 = vunpack.i.h.bf16 %v3229_v43  ;;  %v3230_v44 = vunpack.i.l.bf16 %v3229_v43 }
 0x85a   : > { %v2378_v45 = vsel %vm579_vm2, %v2368_v24, %v3230_v44  ;;  %v2379_v40 = vsel %vm579_vm2, %v2369_v32, %v3231_v36 }
 0x85b   : > { %v2380_v22 = vpack.c.bf16 %v2379_v40, %v2378_v45 }
 0x85d   : > { %2523 = vmatmul.mubr.bf16.vlgmr.msra.gmra.mrb[28].mxu0 %v2380_v22 }
 0x930   : > { %v2524_v30 = vpop.f32.mrb[28].mxu0 }
 0x931   : > { %v2525_v37 = vadd.f32 %v2964_v20, %v2524_v30  ;;  %v2526_v53 = vpop.f32.mrb[29].mxu0 }
 0x932   : > { %v2527_v42 = vpop.f32.mrb[30].mxu0 }
 0x933   : > { %v2528_v54 = vadd.f32 %v2964_v20, %v2527_v42  ;;  %v2529_v46 = vpop.f32.mrb[31].mxu0  ;;  %v2531_v55 = vmax.f32 %v2525_v37, 0.0 }
 0x935   : > { %v2532_v56 = vmax.f32 %v2528_v54, 0.0 }
 0x937   : > { %v2533_v39 = vpack.c.bf16 %v2532_v56, %v2531_v55 }
 0x939   : > { %3091 = vmatmul.mubr.msk.bf16.vlgmr.msra.gmra.mrb[32].mxu1 %vm579_vm2, %v2533_v39 }
 0x93a   : > { %3095 = vmatpush3.bf16.msra.mxu1 %v3296_v59  ;;  %3102 = vmatprep.mubr.msk.bf16.mxu1 %vm3371_vm11, %v3367_v6 }
 0x93b   : > { %3096 = vmatprep.subr.bf16.mxu1 %v3367_v6 }
 0x93e   : > { %3097 = vmatpush3.bf16.msra.mxu1 %v3297_v60 }
 0x93f   : > { %3098 = vmatprep.subr.bf16.mxu1 %v3367_v6 }
 0x942   : > { %3099 = vmatpush3.bf16.msra.mxu1 %v3298_v47 }
 0x943   : > { %3100 = vmatprep.subr.bf16.mxu1 %v3367_v6 }
 0x946   : > { %3101 = vmatpush3.bf16.msra.mxu1 %v3299_v51 }
 0xa0c   : > { %v2612_v0 = vpop.f32.mrb[32].mxu1 }
 0xa0d   : > { %v2613_v2 = vadd.f32 %v2987_v61, %v2612_v0  ;;  %v3092_v3 = vpop.f32.mrb[33].mxu1 }
 0xa0e   : > { %v2615_v4 = vpop.f32.mrb[34].mxu1 }
 0xa0f   : > { %v2619_v5 = vadd.f32 %v2613_v2, %v2356_v34  ;;  %v2616_v7 = vadd.f32 %v2987_v61, %v2615_v4  ;;  %v3093_v48 = vpop.f32.mrb[35].mxu1 }
 0xa11   : > { %v2620_v6 = vadd.f32 %v2616_v7, %v4152_v26  ;;  %v2621_v50 = vmax.f32 %v2619_v5, 0.0 }
 0xa13   : > { %v2622_v1 = vmax.f32 %v2620_v6, 0.0 }
 0xa15   : > { %v2623_v8 = vpack.c.bf16 %v2622_v1, %v2621_v50 }
 0xa17   : > { %3103 = vmatmul.mubr.msk.bf16.vlgmr.msra.gmra.mrb[36].mxu1 %vm579_vm2, %v2623_v8 }
 0xaea   : > { %v2700_v12 = vpop.f32.mrb[36].mxu1 }
 0xaeb   : > { %v2701_v16 = vadd.f32 %v2993_v11, %v2700_v12  ;;  %v3104_v15 = vpop.f32.mrb[37].mxu1 }
 0xaec   : > { %v2703_v17 = vpop.f32.mrb[38].mxu1 }
 0xaed   : > { %2707 = vst.msk [vmem:[%s325_s22] sm:$0xff] %vm579_vm2, %v2701_v16  ;;  %v2704_v14 = vadd.f32 %v2993_v11, %v2703_v17  ;;  %v3105_v13 = vpop.f32.mrb[39].mxu1 }
 0xaef   : > { %2708 = vst.msk [vmem:[%s325_s22 + $0x8] sm:$0xff] %vm579_vm2, %v2704_v14 }
 0xaf0   : > { %3313 = shalt.err (!%p3310_p3)
}
 0xaf1   : > { %s3314_s14 = scalar_lea.hbm %s4217_s28, 256  ;;  %s3318_s25 = scalar_lea.hbm %s4270_s9, 512 }
 0xaf2   : > { %p3315_p4 = scmp.ne.s32.totalorder %s4217_s28, %s3314_s14  ;;  %p3319_p9 = scmp.lt.u32.totalorder %s4217_s28, %s4270_s9 }
 0xaf3   : > { %p3320_p10 = scmp.lt.u32.totalorder %s3318_s25, %s3314_s14  ;;  %p3322_p12 = scmp.lt.u32.totalorder %s3314_s14, %s4217_s28 }
 0xaf4   : > { %p3316_p7 = pnand %p3315_p4, %p3463_p5 }
 0xaf5   : > { %p3321_p11 = por %p3320_p10, %p3319_p9 }
 0xaf6   : > { %p3317_p8 = pneg %p3316_p7 }
 0xaf7   : > { %p3323_p13 = por %p3322_p12, %p3321_p11 }
 0xaf9   : > { %p3324_p0 = pnand %p3323_p13, %p3317_p8 }
 0xafb   : > { %3327 = shalt.err (!%p3324_p0)
}
 0xafc   : > { %s3373_s24 = smov 128   ;;  %s3374_s29 = smov 8  }
 0xafd   : > { %3106 = dma.vmem_to_hbm [thread:$0]  (%p3463_p5), %s4211_s23, 256, %s4217_s28, %s4220_s13, %s3373_s24, %s3373_s24, %s3374_s29  }
 0xafe PF: > { %p3112_p1 = scmp.ge.s32.totalorder %s3362_s12, 2  ;;  %s2738_s16 = sand.u32 1, %s3350_s30  }
 0xaff   : > { %s2739_s17 = scalar_lea.sflag [#allocation4], %s2738_s16 }
 0xb00   : > { %p3109_p2 = pnand %p3112_p1, %p3467_p6 }
 0xb02   : > { %3345 = dma.done.wait (!%p3109_p2), %s2739_s17, 256  }
 0xb03   : > { %3347 = vsyncadd (!%p3109_p2), %s2739_s17, 4294967040  ;;  %p19_p3 = scmp.ge.s32.totalorder %s3450_s15, 4   ;;  %s4273_s30 = smov %s3354_s10 }
 0xb04   : > { %s4274_s10 = smov %s3358_s11  ;;  %s4275_s11 = smov %s3461_s18 }
 0xb05   : > { %s4276_s12 = smov %s3450_s15  ;;  %21 = sbr.rel (!%p19_p3) target bundleno = 3 (0x3), region = 103 }
 0xb0c   :  { %2744 = vsyncpa [#allocation4], 1 }
 0xb0d   :  { %2746 = vsyncpa [#allocation4 + $0x1], 1 }

</bundles_post_ra>
